<compile_context>
chip_gen: v7x
topology: tpu7x:2x2x1
jax: 0.10.0
libtpu: 0.0.40
codegen_flags: <defaults>
</compile_context>

<pallas_src>
import functools

import jax
import jax.numpy as jnp
import numpy as np
from jax.experimental import pallas as pl
from jax.experimental.pallas import tpu as pltpu

_NEG_INF = -1e30          # suppresses conv positions that do not exist in the reference
_LANE = 128


def _round_up(x, m):
    return ((x + m - 1) // m) * m


# ----------------------------------------------------------------------------
# Fused kernel: tap-packed multi-window Conv1d + pad/validity mask
#               + max-over-time + fc -> ReLU -> top_layer
# ----------------------------------------------------------------------------
def textcnn_fused_kernel(mpad_ref, emb_ref, wtap_ref, w1_ref, b1_ref,
                         w2_ref, b2_ref, out_ref, *, kernel_wins, dim_channel):
    # mpad_ref : (Bt, L)        f32  additive pad mask (-100 where token == pad, else 0)
    # emb_ref  : (Bt, L_ext, E) bf16 time-extended embeddings (L_ext = L + n_taps - 1)
    # wtap_ref : (KP, CP)       bf16 tap-packed conv weights (KP = n_taps*E, CP = 128)
    # w1_ref   : (CP, FP) f32,  b1_ref: (1, FP) f32  (conv bias already folded in)
    # w2_ref   : (FP, NCP) f32, b2_ref: (1, NCP) f32
    # out_ref  : (Bt, NCP)      f32  lane-dense logits (padded num_class)
    Bt, L = mpad_ref.shape
    _, L_ext, E = emb_ref.shape
    n_taps = L_ext - L + 1
    KP, CP = wtap_ref.shape
    C = dim_channel

    emb = emb_ref[...]                                           # read emb once (bf16)

    # im2col unfold (built once from VMEM-resident emb), then ONE MXU matmul with a
    # deep (KP = n_taps*E) contraction covering every window/tap at once.
    unfolded = jnp.concatenate([emb[:, k:k + L, :] for k in range(n_taps)], axis=-1)
    acc = jnp.dot(unfolded.reshape(Bt * L, KP), wtap_ref[...],
                  preferred_element_type=jnp.float32)            # (Bt*L, CP) f32
    acc = acc.reshape(Bt, L, CP)

    # Per-window additive masks built in-kernel from the single (Bt, L) pad mask:
    #   * shift by (win-1): mask at conv output t refers to token t + win - 1
    #   * positions past T_i = L - win + 1 do not exist in the reference -> -1e30
    mpad = mpad_ref[...]                                         # (Bt, L) f32
    ch = jax.lax.broadcasted_iota(jnp.int32, (1, 1, CP), 2)
    for i, win in enumerate(kernel_wins):
        T = L - win + 1
        if win > 1:
            m_i = jnp.concatenate(
                [mpad[:, win - 1:],
                 jnp.full((Bt, L - T), _NEG_INF, jnp.float32)], axis=1)
        else:
            m_i = mpad
        sel = (ch >= i * C) & (ch < (i + 1) * C)                 # (1, 1, CP)
        acc = acc + jnp.where(sel, m_i[:, :, None], 0.0)

    # Max over time. Conv bias is folded into b1 (max(x+b) = max(x)+b, then linear).
    pooled = jnp.max(acc, axis=1)                                # (Bt, CP) f32

    # fc -> ReLU -> top_layer (f32 weights; lane-dense FP / NCP).
    h = jnp.dot(pooled, w1_ref[...], preferred_element_type=jnp.float32) + b1_ref[...]
    h = jnp.maximum(h, 0.0)
    out_ref[...] = jnp.dot(h, w2_ref[...], preferred_element_type=jnp.float32) + b2_ref[...]


# ----------------------------------------------------------------------------
# One-time parameter preparation (hoisted out of the forward path)
# ----------------------------------------------------------------------------
def prepare_params(params, kernel_wins, dim_channel):
    K = len(kernel_wins)
    C = dim_channel
    win_max = max(kernel_wins)
    E = params["embed"].shape[1]
    F = params["fc_w"].shape[0]
    num_class = params["top_w"].shape[0]

    CP = _round_up(K * C, _LANE)        # lane-dense packed conv channels
    FP = _round_up(F, _LANE)            # lane-dense hidden width
    NCP = _round_up(num_class, _LANE)   # lane-dense logits
    # Packed contraction depth: win_max*E rounded up to a 128 multiple (in units of E).
    n_taps = -(-_round_up(win_max * E, _LANE) // E)
    KP = n_taps * E

    # Tap-packed conv weights: rows k*E:(k+1)*E hold tap k; cols i*C:(i+1)*C hold window i.
    wtap = jnp.zeros((KP, CP), jnp.float32)
    cbias = jnp.zeros((CP,), jnp.float32)
    for i, win in enumerate(kernel_wins):
        w = params["conv_w"][i]                                   # (C, E, win)
        for k in range(win):
            wtap = wtap.at[k * E:(k + 1) * E, i * C:(i + 1) * C].set(w[:, :, k].T)
        cbias = cbias.at[i * C:(i + 1) * C].set(params["conv_b"][i])

    w1 = jnp.zeros((CP, FP), jnp.float32).at[:K * C, :F].set(params["fc_w"].T)
    b1 = jnp.zeros((1, FP), jnp.float32).at[0, :F].set(params["fc_b"])
    b1 = b1 + (cbias[None, :] @ w1)                               # fold conv bias (exact)
    w2 = jnp.zeros((FP, NCP), jnp.float32).at[:F, :num_class].set(params["top_w"].T)
    b2 = jnp.zeros((1, NCP), jnp.float32).at[0, :num_class].set(params["top_b"])

    return {
        "embed": params["embed"].astype(jnp.bfloat16),            # bf16 halves HBM traffic
        "wtap": wtap.astype(jnp.bfloat16),
        "w1": w1, "b1": b1, "w2": w2, "b2": b2,
    }


def _pick_batch_tile(B, per_row_bytes, fixed_bytes, budget_bytes=24 * 1024 * 1024):
    """Largest batch tile (multiple of 8) whose working set fits a conservative VMEM
    budget (sized for v7x's 64 MiB/TC; v5e/v6e have 128 MiB and more headroom)."""
    avail = max(budget_bytes - fixed_bytes, 8 * per_row_bytes)
    bt = max(8, (avail // max(per_row_bytes, 1)) // 8 * 8)
    bt = min(bt, _round_up(B, 8))
    if B > 8:
        # Keep at least 2 (balanced) grid steps so v7x's second TensorCore has work.
        bt = min(bt, _round_up(-(-B // 2), 8))
    return max(bt, 8)


# ----------------------------------------------------------------------------
# Forward pass (jitted wrapper; embedding gather + tiny mask prep in XLA glue)
# ----------------------------------------------------------------------------
def textcnn_forward(prep, x_ids, *, kernel_wins, dim_channel, pad_id, num_class):
    B, L = x_ids.shape
    E = prep["embed"].shape[1]
    KP, CP = prep["wtap"].shape
    n_taps = KP // E
    FP = prep["w1"].shape[1]
    NCP = prep["w2"].shape[1]
    L_ext = L + n_taps - 1

    # VMEM budgeting: double-buffered streamed blocks + in-kernel intermediates.
    per_row = (2 * L_ext * E * 2          # emb block (bf16), double-buffered
               + 2 * L * 4                # pad-mask block, double-buffered
               + 2 * NCP * 4              # out block, double-buffered
               + L * KP * 2               # unfolded im2col (bf16)
               + 2 * L * CP * 4)          # acc f32 + mask/select temporaries
    fixed = 2 * (KP * CP * 2 + CP * FP * 4 + FP * NCP * 4 + (FP + NCP) * 4)
    Bt = _pick_batch_tile(B, per_row, fixed)
    B_pad = _round_up(B, Bt)
    grid = (B_pad // Bt,)

    # Pad token ids (not emb): batch up to B_pad, time by the extra taps. Exact, since
    # the appended positions either hit zero-weight taps or -1e30-masked outputs.
    x_ext = jnp.pad(x_ids, ((0, B_pad - B), (0, n_taps - 1)), constant_values=pad_id)
    emb = prep["embed"][x_ext]                                    # (B_pad, L_ext, E) bf16
    mpad = jnp.where(x_ext[:, :L] == pad_id,
                     jnp.float32(-100.0), jnp.float32(0.0))       # (B_pad, L)

    kern = functools.partial(textcnn_fused_kernel,
                             kernel_wins=tuple(kernel_wins), dim_channel=dim_channel)
    out = pl.pallas_call(
        kern,
        out_shape=jax.ShapeDtypeStruct((B_pad, NCP), jnp.float32),
        grid=grid,
        in_specs=[
            pl.BlockSpec((Bt, L), lambda b: (b, 0)),              # pad mask (batch-tiled)
            pl.BlockSpec((Bt, L_ext, E), lambda b: (b, 0, 0)),    # emb (batch-tiled)
            pl.BlockSpec((KP, CP), lambda b: (0, 0)),             # tap-packed conv weights
            pl.BlockSpec((CP, FP), lambda b: (0, 0)),             # fc weight
            pl.BlockSpec((1, FP), lambda b: (0, 0)),              # fc bias (+ folded conv bias)
            pl.BlockSpec((FP, NCP), lambda b: (0, 0)),            # top weight
            pl.BlockSpec((1, NCP), lambda b: (0, 0)),             # top bias
        ],
        out_specs=pl.BlockSpec((Bt, NCP), lambda b: (b, 0)),
        compiler_params=pltpu.CompilerParams(
            dimension_semantics=("parallel",),                    # megacore on v7x
            vmem_limit_bytes=48 * 1024 * 1024),
    )(mpad, emb, prep["wtap"], prep["w1"], prep["b1"], prep["w2"], prep["b2"])

    # TODO(synk): nn.Dropout is identity at inference time; intentionally omitted.
    return out[:B, :num_class]


# ----------------------------------------------------------------------------
# Pure-JAX reference (same bf16 rounding of embed/conv weights, f32 accumulation)
# ----------------------------------------------------------------------------
def ref_forward(params, x_ids, kernel_wins, pad_id):
    emb = params["embed"].astype(jnp.bfloat16).astype(jnp.float32)[x_ids]
    mask = jnp.where(x_ids == pad_id, -100.0, 0.0)
    L = emb.shape[1]
    pooled = []
    for i, win in enumerate(kernel_wins):
        w = params["conv_w"][i].astype(jnp.bfloat16).astype(jnp.float32)   # (C, E, win)
        b = params["conv_b"][i]
        T = L - win + 1
        acc = jnp.zeros((emb.shape[0], T, w.shape[0]), jnp.float32)
        for k in range(win):
            acc += jnp.einsum("ble,ce->blc", emb[:, k:k + T, :], w[:, :, k],
                              preferred_element_type=jnp.float32)
        acc += b[None, None, :]
        acc += mask[:, win - 1:][:, :, None]
        pooled.append(jnp.max(acc, axis=1))
    feat = jnp.concatenate(pooled, axis=1)
    h = jnp.maximum(feat @ params["fc_w"].T + params["fc_b"], 0.0)
    return h @ params["top_w"].T + params["top_b"]


if __name__ == "__main__":
    # Small, deterministic configuration consistent with the module's __init__.
    vocab_size = 50
    padding_token_id = 0
    dim_channel = 8
    kernel_wins = (3, 4, 5)
    num_class = 10
    embedding_dim = 32
    num_class_features = 64
    B, L = 2, 16

    key = jax.random.PRNGKey(0)
    keys = jax.random.split(key, 8 + 2 * len(kernel_wins))

    params = {
        "embed": jax.random.normal(keys[0], (vocab_size, embedding_dim), jnp.float32),
        "conv_w": [
            0.1 * jax.random.normal(keys[1 + 2 * i], (dim_channel, embedding_dim, w), jnp.float32)
            for i, w in enumerate(kernel_wins)
        ],
        "conv_b": [
            0.1 * jax.random.normal(keys[2 + 2 * i], (dim_channel,), jnp.float32)
            for i, _ in enumerate(kernel_wins)
        ],
        "fc_w": 0.05
        * jax.random.normal(
            keys[-4], (num_class_features, len(kernel_wins) * dim_channel), jnp.float32
        ),
        "fc_b": 0.05 * jax.random.normal(keys[-3], (num_class_features,), jnp.float32),
        "top_w": 0.1 * jax.random.normal(keys[-2], (num_class, num_class_features), jnp.float32),
        "top_b": jnp.zeros((num_class,), jnp.float32),
    }

    x_ids = jax.random.randint(keys[-1], (B, L), 0, vocab_size, dtype=jnp.int32)
    # force some padding tokens so the mask path is exercised
    x_ids = x_ids.at[:, -3:].set(padding_token_id)

    prep = prepare_params(params, kernel_wins, dim_channel)
    fwd = jax.jit(functools.partial(
        textcnn_forward,
        kernel_wins=kernel_wins,
        dim_channel=dim_channel,
        pad_id=padding_token_id,
        num_class=num_class,
    ))

    out = jax.block_until_ready(fwd(prep, x_ids))

    ref = ref_forward(params, x_ids, kernel_wins, padding_token_id)
    np.testing.assert_allclose(np.asarray(out), np.asarray(ref), rtol=2e-3, atol=2e-3)

    print("KERNEL_OK")
</pallas_src>

<mosaic_0001>
module attributes {stable_mosaic.version = 11 : i64} {
  func.func @textcnn_fused_kernel(%arg0: i32, %arg1: memref<8x16xf32, #tpu.memory_space<vmem>>, %arg2: memref<8x23x32xbf16, #tpu.memory_space<vmem>>, %arg3: memref<256x128xbf16, #tpu.memory_space<vmem>>, %arg4: memref<128x128xf32, #tpu.memory_space<vmem>>, %arg5: memref<1x128xf32, #tpu.memory_space<vmem>>, %arg6: memref<128x128xf32, #tpu.memory_space<vmem>>, %arg7: memref<1x128xf32, #tpu.memory_space<vmem>>, %arg8: memref<8x128xf32, #tpu.memory_space<vmem>>) attributes {dimension_semantics = [#tpu.dimension_semantics<parallel>], iteration_bounds = array<i64: 1>, scalar_prefetch = 0 : i64, scratch_operands = 0 : i64, tpu.core_type = #tpu.core_type<tc>, window_params = [{transform_indices = @transform_0, window_bounds = array<i64: 8, 16>}, {transform_indices = @transform_1, window_bounds = array<i64: 8, 23, 32>}, {pipeline_mode = #tpu.pipeline_mode<synchronous>, transform_indices = @transform_2, window_bounds = array<i64: 256, 128>}, {pipeline_mode = #tpu.pipeline_mode<synchronous>, transform_indices = @transform_3, window_bounds = array<i64: 128, 128>}, {pipeline_mode = #tpu.pipeline_mode<synchronous>, transform_indices = @transform_4, window_bounds = array<i64: 1, 128>}, {pipeline_mode = #tpu.pipeline_mode<synchronous>, transform_indices = @transform_5, window_bounds = array<i64: 128, 128>}, {pipeline_mode = #tpu.pipeline_mode<synchronous>, transform_indices = @transform_6, window_bounds = array<i64: 1, 128>}, {transform_indices = @transform_7, window_bounds = array<i64: 8, 128>}]} {
    %c0 = arith.constant 0 : index
    %c0_0 = arith.constant 0 : index
    %c0_1 = arith.constant 0 : index
    %0 = vector.load %arg2[%c0, %c0_0, %c0_1] : memref<8x23x32xbf16, #tpu.memory_space<vmem>>, vector<8x23x32xbf16>
    %1 = vector.extract_strided_slice %0 {offsets = [0, 0, 0], sizes = [8, 16, 32], strides = [1, 1, 1]} : vector<8x23x32xbf16> to vector<8x16x32xbf16>
    %2 = vector.extract_strided_slice %0 {offsets = [0, 1, 0], sizes = [8, 16, 32], strides = [1, 1, 1]} : vector<8x23x32xbf16> to vector<8x16x32xbf16>
    %3 = vector.extract_strided_slice %0 {offsets = [0, 2, 0], sizes = [8, 16, 32], strides = [1, 1, 1]} : vector<8x23x32xbf16> to vector<8x16x32xbf16>
    %4 = vector.extract_strided_slice %0 {offsets = [0, 3, 0], sizes = [8, 16, 32], strides = [1, 1, 1]} : vector<8x23x32xbf16> to vector<8x16x32xbf16>
    %5 = vector.extract_strided_slice %0 {offsets = [0, 4, 0], sizes = [8, 16, 32], strides = [1, 1, 1]} : vector<8x23x32xbf16> to vector<8x16x32xbf16>
    %6 = vector.extract_strided_slice %0 {offsets = [0, 5, 0], sizes = [8, 16, 32], strides = [1, 1, 1]} : vector<8x23x32xbf16> to vector<8x16x32xbf16>
    %7 = vector.extract_strided_slice %0 {offsets = [0, 6, 0], sizes = [8, 16, 32], strides = [1, 1, 1]} : vector<8x23x32xbf16> to vector<8x16x32xbf16>
    %8 = vector.extract_strided_slice %0 {offsets = [0, 7, 0], sizes = [8, 16, 32], strides = [1, 1, 1]} : vector<8x23x32xbf16> to vector<8x16x32xbf16>
    %9 = tpu.concatenate %1, %2, %3, %4, %5, %6, %7, %8 in 2 : vector<8x16x32xbf16>, vector<8x16x32xbf16>, vector<8x16x32xbf16>, vector<8x16x32xbf16>, vector<8x16x32xbf16>, vector<8x16x32xbf16>, vector<8x16x32xbf16>, vector<8x16x32xbf16> -> vector<8x16x256xbf16>
    %10 = vector.shape_cast %9 : vector<8x16x256xbf16> to vector<128x256xbf16>
    %c0_2 = arith.constant 0 : index
    %c0_3 = arith.constant 0 : index
    %11 = vector.load %arg3[%c0_2, %c0_3] : memref<256x128xbf16, #tpu.memory_space<vmem>>, vector<256x128xbf16>
    %cst = arith.constant dense<0.000000e+00> : vector<128x128xf32>
    %12 = tpu.matmul %10, %11, %cst {dimension_numbers = #tpu.dot_dimension_numbers<[1], [0], [0], [1], [0, 0, 1, 1], [], []>} : vector<128x256xbf16>, vector<256x128xbf16>, vector<128x128xf32> -> vector<128x128xf32>
    %13 = vector.shape_cast %12 : vector<128x128xf32> to vector<8x16x128xf32>
    %c0_4 = arith.constant 0 : index
    %c0_5 = arith.constant 0 : index
    %14 = vector.load %arg1[%c0_4, %c0_5] : memref<8x16xf32, #tpu.memory_space<vmem>>, vector<8x16xf32>
    %15 = tpu.iota {dimensions = array<i32: 2>} : vector<1x1x128xi32>
    %16 = vector.extract_strided_slice %14 {offsets = [0, 2], sizes = [8, 14], strides = [1, 1]} : vector<8x16xf32> to vector<8x14xf32>
    %cst_6 = arith.constant -1.000000e+30 : f32
    %17 = vector.broadcast %cst_6 : f32 to vector<8x2xf32>
    %18 = tpu.concatenate %16, %17 in 1 : vector<8x14xf32>, vector<8x2xf32> -> vector<8x16xf32>
    %c0_i32 = arith.constant 0 : i32
    %19 = vector.broadcast %c0_i32 : i32 to vector<1x1x128xi32>
    %20 = arith.cmpi sge, %15, %19 : vector<1x1x128xi32>
    %c8_i32 = arith.constant 8 : i32
    %21 = vector.broadcast %c8_i32 : i32 to vector<1x1x128xi32>
    %22 = arith.cmpi slt, %15, %21 : vector<1x1x128xi32>
    %23 = arith.andi %20, %22 : vector<1x1x128xi1>
    %24 = vector.shape_cast %18 : vector<8x16xf32> to vector<8x16x1xf32>
    %cst_7 = arith.constant 0.000000e+00 : f32
    %25 = vector.shape_cast %23 : vector<1x1x128xi1> to vector<1x1x128xi1>
    %26 = vector.broadcast %25 : vector<1x1x128xi1> to vector<8x16x128xi1>
    %27 = vector.shape_cast %24 : vector<8x16x1xf32> to vector<8x16x1xf32>
    %28 = vector.broadcast %27 : vector<8x16x1xf32> to vector<8x16x128xf32>
    %29 = vector.broadcast %cst_7 : f32 to vector<8x16x128xf32>
    %30 = arith.select %26, %28, %29 : vector<8x16x128xi1>, vector<8x16x128xf32>
    %31 = arith.addf %13, %30 : vector<8x16x128xf32>
    %32 = vector.extract_strided_slice %14 {offsets = [0, 3], sizes = [8, 13], strides = [1, 1]} : vector<8x16xf32> to vector<8x13xf32>
    %cst_8 = arith.constant -1.000000e+30 : f32
    %33 = vector.broadcast %cst_8 : f32 to vector<8x3xf32>
    %34 = tpu.concatenate %32, %33 in 1 : vector<8x13xf32>, vector<8x3xf32> -> vector<8x16xf32>
    %c8_i32_9 = arith.constant 8 : i32
    %35 = vector.broadcast %c8_i32_9 : i32 to vector<1x1x128xi32>
    %36 = arith.cmpi sge, %15, %35 : vector<1x1x128xi32>
    %c16_i32 = arith.constant 16 : i32
    %37 = vector.broadcast %c16_i32 : i32 to vector<1x1x128xi32>
    %38 = arith.cmpi slt, %15, %37 : vector<1x1x128xi32>
    %39 = arith.andi %36, %38 : vector<1x1x128xi1>
    %40 = vector.shape_cast %34 : vector<8x16xf32> to vector<8x16x1xf32>
    %cst_10 = arith.constant 0.000000e+00 : f32
    %41 = vector.shape_cast %39 : vector<1x1x128xi1> to vector<1x1x128xi1>
    %42 = vector.broadcast %41 : vector<1x1x128xi1> to vector<8x16x128xi1>
    %43 = vector.shape_cast %40 : vector<8x16x1xf32> to vector<8x16x1xf32>
    %44 = vector.broadcast %43 : vector<8x16x1xf32> to vector<8x16x128xf32>
    %45 = vector.broadcast %cst_10 : f32 to vector<8x16x128xf32>
    %46 = arith.select %42, %44, %45 : vector<8x16x128xi1>, vector<8x16x128xf32>
    %47 = arith.addf %31, %46 : vector<8x16x128xf32>
    %48 = vector.extract_strided_slice %14 {offsets = [0, 4], sizes = [8, 12], strides = [1, 1]} : vector<8x16xf32> to vector<8x12xf32>
    %cst_11 = arith.constant -1.000000e+30 : f32
    %49 = vector.broadcast %cst_11 : f32 to vector<8x4xf32>
    %50 = tpu.concatenate %48, %49 in 1 : vector<8x12xf32>, vector<8x4xf32> -> vector<8x16xf32>
    %c16_i32_12 = arith.constant 16 : i32
    %51 = vector.broadcast %c16_i32_12 : i32 to vector<1x1x128xi32>
    %52 = arith.cmpi sge, %15, %51 : vector<1x1x128xi32>
    %c24_i32 = arith.constant 24 : i32
    %53 = vector.broadcast %c24_i32 : i32 to vector<1x1x128xi32>
    %54 = arith.cmpi slt, %15, %53 : vector<1x1x128xi32>
    %55 = arith.andi %52, %54 : vector<1x1x128xi1>
    %56 = vector.shape_cast %50 : vector<8x16xf32> to vector<8x16x1xf32>
    %cst_13 = arith.constant 0.000000e+00 : f32
    %57 = vector.shape_cast %55 : vector<1x1x128xi1> to vector<1x1x128xi1>
    %58 = vector.broadcast %57 : vector<1x1x128xi1> to vector<8x16x128xi1>
    %59 = vector.shape_cast %56 : vector<8x16x1xf32> to vector<8x16x1xf32>
    %60 = vector.broadcast %59 : vector<8x16x1xf32> to vector<8x16x128xf32>
    %61 = vector.broadcast %cst_13 : f32 to vector<8x16x128xf32>
    %62 = arith.select %58, %60, %61 : vector<8x16x128xi1>, vector<8x16x128xf32>
    %63 = arith.addf %47, %62 : vector<8x16x128xf32>
    %cst_14 = arith.constant dense<0xFF800000> : vector<8x128xf32>
    %64 = vector.multi_reduction <maximumf>, %63, %cst_14 [1] : vector<8x16x128xf32> to vector<8x128xf32>
    %c0_15 = arith.constant 0 : index
    %c0_16 = arith.constant 0 : index
    %65 = vector.load %arg4[%c0_15, %c0_16] : memref<128x128xf32, #tpu.memory_space<vmem>>, vector<128x128xf32>
    %cst_17 = arith.constant dense<0.000000e+00> : vector<8x128xf32>
    %66 = tpu.matmul %64, %65, %cst_17 {dimension_numbers = #tpu.dot_dimension_numbers<[1], [0], [0], [1], [0, 0, 1, 1], [], []>} : vector<8x128xf32>, vector<128x128xf32>, vector<8x128xf32> -> vector<8x128xf32>
    %c0_18 = arith.constant 0 : index
    %c0_19 = arith.constant 0 : index
    %67 = vector.load %arg5[%c0_18, %c0_19] : memref<1x128xf32, #tpu.memory_space<vmem>>, vector<1x128xf32>
    %68 = vector.broadcast %67 : vector<1x128xf32> to vector<8x128xf32>
    %69 = arith.addf %66, %68 : vector<8x128xf32>
    %cst_20 = arith.constant 0.000000e+00 : f32
    %70 = vector.broadcast %cst_20 : f32 to vector<8x128xf32>
    %71 = arith.maximumf %69, %70 : vector<8x128xf32>
    %c0_21 = arith.constant 0 : index
    %c0_22 = arith.constant 0 : index
    %72 = vector.load %arg6[%c0_21, %c0_22] : memref<128x128xf32, #tpu.memory_space<vmem>>, vector<128x128xf32>
    %cst_23 = arith.constant dense<0.000000e+00> : vector<8x128xf32>
    %73 = tpu.matmul %71, %72, %cst_23 {dimension_numbers = #tpu.dot_dimension_numbers<[1], [0], [0], [1], [0, 0, 1, 1], [], []>} : vector<8x128xf32>, vector<128x128xf32>, vector<8x128xf32> -> vector<8x128xf32>
    %c0_24 = arith.constant 0 : index
    %c0_25 = arith.constant 0 : index
    %74 = vector.load %arg7[%c0_24, %c0_25] : memref<1x128xf32, #tpu.memory_space<vmem>>, vector<1x128xf32>
    %75 = vector.broadcast %74 : vector<1x128xf32> to vector<8x128xf32>
    %76 = arith.addf %73, %75 : vector<8x128xf32>
    %c0_26 = arith.constant 0 : index
    %c0_27 = arith.constant 0 : index
    %77 = vector.load %arg8[%c0_26, %c0_27] : memref<8x128xf32, #tpu.memory_space<vmem>>, vector<8x128xf32>
    tpu.vector_store %arg8[%c0_26, %c0_27], %76 {strides = array<i32>} : memref<8x128xf32, #tpu.memory_space<vmem>>, vector<8x128xf32>,
    return
  }
  func.func @transform_0(%arg0: i32) -> (i32, i32) {
    %c0_i32 = arith.constant 0 : i32
    %c0_i32_0 = arith.constant 0 : i32
    return %arg0, %c0_i32 : i32, i32
  }
  func.func @transform_1(%arg0: i32) -> (i32, i32, i32) {
    %c0_i32 = arith.constant 0 : i32
    %c0_i32_0 = arith.constant 0 : i32
    %c0_i32_1 = arith.constant 0 : i32
    return %arg0, %c0_i32, %c0_i32_0 : i32, i32, i32
  }
  func.func @transform_2(%arg0: i32) -> (i32, i32) {
    %c0_i32 = arith.constant 0 : i32
    %c0_i32_0 = arith.constant 0 : i32
    %c0_i32_1 = arith.constant 0 : i32
    return %c0_i32, %c0_i32_0 : i32, i32
  }
  func.func @transform_3(%arg0: i32) -> (i32, i32) {
    %c0_i32 = arith.constant 0 : i32
    %c0_i32_0 = arith.constant 0 : i32
    %c0_i32_1 = arith.constant 0 : i32
    return %c0_i32, %c0_i32_0 : i32, i32
  }
  func.func @transform_4(%arg0: i32) -> (i32, i32) {
    %c0_i32 = arith.constant 0 : i32
    %c0_i32_0 = arith.constant 0 : i32
    %c0_i32_1 = arith.constant 0 : i32
    return %c0_i32, %c0_i32_0 : i32, i32
  }
  func.func @transform_5(%arg0: i32) -> (i32, i32) {
    %c0_i32 = arith.constant 0 : i32
    %c0_i32_0 = arith.constant 0 : i32
    %c0_i32_1 = arith.constant 0 : i32
    return %c0_i32, %c0_i32_0 : i32, i32
  }
  func.func @transform_6(%arg0: i32) -> (i32, i32) {
    %c0_i32 = arith.constant 0 : i32
    %c0_i32_0 = arith.constant 0 : i32
    %c0_i32_1 = arith.constant 0 : i32
    return %c0_i32, %c0_i32_0 : i32, i32
  }
  func.func @transform_7(%arg0: i32) -> (i32, i32) {
    %c0_i32 = arith.constant 0 : i32
    %c0_i32_0 = arith.constant 0 : i32
    return %arg0, %c0_i32 : i32, i32
  }
}

</mosaic_0001>

<bundles_post_ra>
// kernel: textcnn_forward.1
= control target key start
LH: loop header
LB: loop body
LE: loop exit
PB: predicated region body
PF: predicated region fallthrough
CT: control target
= control target key end

     0   :  { %vm456_vm0 = vcmask 1044480   ;;  %vm383_vm1 = vsmask.f32 5376  ;;  %vm228_vm2 = vcmask 1046528   ;;  %vm269_vm3 = vsmask.f32 6400  ;;  %s2752_s1 = inlined_call_operand.vmem [shape: bf16[8,23,32], index: 1, kind: input, shape index: {}]   ;;  %s2753_s2 = inlined_call_operand.vmem [shape: bf16[256,128], index: 2, kind: input, shape index: {}]   ;;  %s2754_s0 = inlined_call_operand.vmem [shape: f32[8,16], index: 0, kind: input, shape index: {}]   ;;  %s2755_s3 = inlined_call_operand.vmem [shape: f32[128,128], index: 3, kind: input, shape index: {}]   ;;  %s2756_s5 = inlined_call_operand.vmem [shape: f32[128,128], index: 5, kind: input, shape index: {}]   ;;  %s2757_s4 = inlined_call_operand.vmem [shape: f32[1,128], index: 4, kind: input, shape index: {}]   ;;  %s2758_s6 = inlined_call_operand.vmem [shape: f32[1,128], index: 6, kind: input, shape index: {}]   ;;  %s2759_s7 = inlined_call_operand.vmem [shape: f32[8,128], index: 7, kind: output, shape index: {}]  }
   0x1   :  { %v1926_v0 = vld [vmem:[%s2752_s1] sm:$0xff]   ;;  %v1931_v1 = vld [vmem:[%s2752_s1 + $0x8] ss:$0 sps:$4 sm:$0xff]   ;;  %vm115_vm4 = vsmask.f32 7424  ;;  %v1944_v10 = vld [vmem:[%s2752_s1 + $0xc] sm:$0xff]  }
   0x2   :  { %v457_v2 = vrot.slane %v1926_v0, 3  ;;  %v458_v3 = vrot.slane %v1931_v1, 3  ;;  %v229_v4 = vrot.slane %v1926_v0, 1  ;;  %v230_v5 = vrot.slane %v1931_v1, 1  ;;  %v1951_v13 = vld [vmem:[%s2752_s1 + $0x14] ss:$0 sps:$4 sm:$0xff]  }
   0x3   :  { %v117_v6 = vshrl.u32 %v1926_v0, 16  ;;  %v119_v7 = vshll.u32 %v1926_v0, 16  ;;  %v124_v8 = vshll.u32 %v1931_v1, 16  ;;  %v273_v9 = vshrl.u32 %v1931_v1, 16  ;;  %s1874_s9 = smov 64   ;;  %s1875_s10 = smov 32  }
   0x4   :  { %v459_v11 = vsel %vm456_vm0, %v457_v2, %v458_v3  ;;  %v231_v12 = vsel %vm228_vm2, %v229_v4, %v230_v5  ;;  %vm497_vm5 = vsmask.f32 4352  ;;  %v1955_v28 = vshrl.u32 %v1944_v10, 16  ;;  %v1977_v46 = vld [vmem:[%s2752_s1 + $0x20] ss:$0 sps:$4 sm:$0xff]   ;;  %s1876_s13 = smov 96  }
   0x5   :  { %481 = vrot.lane.b32.xlu1 %v459_v11, %s1874_s9  ;;  %v384_v14 = vrot.slane %v117_v6, 2  ;;  %v385_v15 = vrot.slane %v119_v7, 3  ;;  %v387_v16 = vrot.slane %v273_v9, 2  ;;  %v388_v17 = vrot.slane %v124_v8, 3  ;;  %v1986_v51 = vld [vmem:[%s2752_s1 + $0x18] sm:$0xff]   ;;  %v1858_v62 = vld [vmem:[%s2753_s2 + $0x40] sm:$0xff]  }
   0x6   :  { %v270_v18 = vrot.slane %v117_v6, 1  ;;  %v271_v19 = vrot.slane %v119_v7, 2  ;;  %v275_v20 = vrot.slane %v273_v9, 1  ;;  %v276_v21 = vrot.slane %v124_v8, 2  ;;  %v1859_v5 = vld [vmem:[%s2753_s2] sm:$0xff]   ;;  %1617 = vmatprep.subr.bf16.mxu0 %v1858_v62  ;;  %v1864_v62 = vld [vmem:[%s2753_s2 + $0x58] sm:$0xff]  }
   0x7   :  { %v386_v22 = vor.u32 %v385_v15, %v384_v14  ;;  %v389_v23 = vor.u32 %v388_v17, %v387_v16  ;;  %v121_v24 = vrot.slane %v119_v7, 1  ;;  %v126_v25 = vrot.slane %v124_v8, 1  ;;  %1618 = vmatpush3.bf16.msra.mxu0 %v1859_v5  ;;  %v1865_v5 = vld [vmem:[%s2753_s2 + $0x18] sm:$0xff]   ;;  %s1877_s28 = smov 125   ;;  %s1878_s29 = smov 126  }
   0x8   :  { %v272_v26 = vor.u32 %v271_v19, %v270_v18  ;;  %v277_v27 = vor.u32 %v276_v21, %v275_v20  ;;  %v1958_v29 = vshll.u32 %v1944_v10, 16  ;;  %v1963_v32 = vshll.u32 %v1951_v13, 16  ;;  %v2023_v18 = vld [vmem:[%s2752_s1 + $0x24] sm:$0xff]   ;;  %s1879_s30 = smov 124  }
   0x9   :  { %253 = vrot.lane.b32.xlu1 %v231_v12, %s1874_s9  ;;  %v390_v30 = vsel %vm383_vm1, %v386_v22, %v389_v23  ;;  %v122_v31 = vor.u32 %v121_v24, %v117_v6  ;;  %v498_v33 = vrot.slane %v117_v6, 3  ;;  %v499_v36 = vrot.slane %v119_v7, 4  ;;  %v2034_v23 = vld [vmem:[%s2752_s1 + $0x2c] ss:$0 sps:$4 sm:$0xff]  }
   0xa   :  { %440 = vrot.lane.b32.xlu0 %v390_v30, %s1875_s10  ;;  %v278_v34 = vsel %vm269_vm3, %v272_v26, %v277_v27  ;;  %v133_v35 = vrot.slane %v1958_v29, 1  ;;  %v501_v37 = vrot.slane %v273_v9, 3  ;;  %v138_v39 = vrot.slane %v1963_v32, 1 }
   0xb   :  { %v127_v38 = vsel %vm115_vm4, %v122_v31, %v126_v25  ;;  %v502_v40 = vrot.slane %v124_v8, 4  ;;  %v232_v41 = vrot.slane %v1944_v10, 1  ;;  %v500_v43 = vor.u32 %v499_v36, %v498_v33 }
   0xc   :  { %v134_v42 = vor.u32 %v133_v35, %v1955_v28  ;;  %v233_v44 = vrot.slane %v1951_v13, 1  ;;  %v282_v45 = vshrl.u32 %v1951_v13, 16  ;;  %v391_v48 = vrot.slane %v1955_v28, 2 }
   0xd   :  { %342 = vrot.lane.b32.xlu1 %v278_v34, %s1876_s13  ;;  %v503_v47 = vor.u32 %v502_v40, %v501_v37  ;;  %v392_v49 = vrot.slane %v1958_v29, 3  ;;  %v395_v50 = vrot.slane %v1963_v32, 3  ;;  %v279_v54 = vrot.slane %v1955_v28, 1 }
   0xe   :  { %212 = vrot.lane.b32.xlu0 %v127_v38, %s1875_s10  ;;  %v139_v52 = vsel %vm115_vm4, %v134_v42, %v138_v39  ;;  %v394_v53 = vrot.slane %v282_v45, 2  ;;  %v280_v57 = vrot.slane %v1958_v29, 2  ;;  %v284_v58 = vrot.slane %v282_v45, 1 }
   0xf   :  { %v504_v55 = vsel %vm497_vm5, %v500_v43, %v503_v47  ;;  %v393_v56 = vor.u32 %v392_v49, %v391_v48  ;;  %v285_v60 = vrot.slane %v1963_v32, 2  ;;  %v460_v61 = vrot.slane %v1944_v10, 3  ;;  %v1861_v43 = vld [vmem:[%s2753_s2 + $0x8] sm:$0xff]   ;;  %v1862_v49 = vld [vmem:[%s2753_s2 + $0x50] sm:$0xff]  }
  0x10   :  { %v396_v59 = vor.u32 %v395_v50, %v394_v53  ;;  %v234_v63 = vsel %vm228_vm2, %v232_v41, %v233_v44  ;;  %v2001_v2 = vshrl.u32 %v1986_v51, 16  ;;  %v2004_v3 = vshll.u32 %v1986_v51, 16 }
  0x11   :  { %214 = vrot.lane.b32.xlu1 %v139_v52, %s1875_s10  ;;  %v2007_v4 = vshll.u32 %v1977_v46, 16  ;;  %v281_v6 = vor.u32 %v280_v57, %v279_v54  ;;  %v286_v7 = vor.u32 %v285_v60, %v284_v58  ;;  %v461_v8 = vrot.slane %v1951_v13, 3  ;;  %v2086_v60 = vld [vmem:[%s2752_s1 + $0x30] sm:$0xff]  }
  0x12   :  { %554 = vrot.lane.b32.xlu0 %v504_v55, %s1876_s13  ;;  %v505_v9 = vrot.slane %v1955_v28, 3  ;;  %v397_v11 = vsel %vm383_vm1, %v393_v56, %v396_v59  ;;  %v145_v12 = vrot.slane %v2004_v3, 1  ;;  %v506_v14 = vrot.slane %v1958_v29, 4  ;;  %v1863_v55 = vld [vmem:[%s2753_s2 + $0x10] sm:$0xff]  }
  0x13   :  { %v508_v15 = vrot.slane %v282_v45, 3  ;;  %v150_v16 = vrot.slane %v2007_v4, 1  ;;  %v509_v17 = vrot.slane %v1963_v32, 4  ;;  %v235_v21 = vrot.slane %v1986_v51, 1  ;;  %v1860_v32 = vld [vmem:[%s2753_s2 + $0x48] sm:$0xff]  }
  0x14   :  { %v146_v19 = vor.u32 %v145_v12, %v2001_v2  ;;  %v507_v20 = vor.u32 %v506_v14, %v505_v9  ;;  %v2029_v22 = vshrl.u32 %v1977_v46, 16  ;;  %v287_v24 = vsel %vm269_vm3, %v281_v6, %v286_v7  ;;  %1619 = vmatprep.subr.bf16.mxu0 %v1860_v32  ;;  %v1867_v32 = vld [vmem:[%s2753_s2 + $0x20] sm:$0xff]  }
  0x15   :  { %255 = vrot.lane.b32.xlu1 %v234_v63, %s1874_s9  ;;  %v510_v25 = vor.u32 %v509_v17, %v508_v15  ;;  %v398_v26 = vrot.slane %v2001_v2, 2  ;;  %v399_v27 = vrot.slane %v2004_v3, 3  ;;  %v462_v28 = vsel %vm456_vm0, %v460_v61, %v461_v8  ;;  %1620 = vmatpush3.bf16.msra.mxu0 %v1861_v43  ;;  %v2091_v61 = vld [vmem:[%s2752_s1 + $0x38] ss:$0 sps:$4 sm:$0xff]   ;;  %v1866_v17 = vld [vmem:[%s2753_s2 + $0x60] sm:$0xff]  }
  0x16   :  { %442 = vrot.lane.b32.xlu0 %v397_v11, %s1875_s10  ;;  %v236_v29 = vrot.slane %v1977_v46, 1  ;;  %v401_v30 = vrot.slane %v2029_v22, 2  ;;  %v402_v31 = vrot.slane %v2007_v4, 3  ;;  %v288_v33 = vrot.slane %v2001_v2, 1  ;;  %1621 = vmatprep.subr.bf16.mxu0 %v1862_v49  ;;  %v2156_v43 = vld [vmem:[%s2752_s1 + $0x44] ss:$0 sps:$4 sm:$0xff]  }
  0x17   :  { %v289_v34 = vrot.slane %v2004_v3, 2  ;;  %v151_v35 = vsel %vm115_vm4, %v146_v19, %v150_v16  ;;  %v511_v36 = vsel %vm497_vm5, %v507_v20, %v510_v25  ;;  %v293_v37 = vrot.slane %v2029_v22, 1 }
  0x18   :  { %v294_v38 = vrot.slane %v2007_v4, 2  ;;  %v400_v39 = vor.u32 %v399_v27, %v398_v26  ;;  %v463_v40 = vrot.slane %v1986_v51, 3  ;;  %v464_v41 = vrot.slane %v1977_v46, 3 }
  0x19   :  { %344 = vrot.lane.b32.xlu1 %v287_v24, %s1876_s13  ;;  %v2058_v42 = vshll.u32 %v2023_v18, 16  ;;  %v403_v44 = vor.u32 %v402_v31, %v401_v30  ;;  %v2064_v45 = vshrl.u32 %v2023_v18, 16  ;;  %v2067_v47 = vshll.u32 %v2034_v23, 16  ;;  %1622 = vmatpush3.bf16.msra.mxu0 %v1863_v55 }
  0x1a   :  { %483 = vrot.lane.b32.xlu0 %v462_v28, %s1874_s9  ;;  %v512_v48 = vrot.slane %v2001_v2, 3  ;;  %v290_v50 = vor.u32 %v289_v34, %v288_v33  ;;  %v513_v53 = vrot.slane %v2004_v3, 4  ;;  %v515_v54 = vrot.slane %v2029_v22, 3  ;;  %1623 = vmatprep.subr.bf16.mxu0 %v1864_v62 }
  0x1b   :  { %v157_v52 = vrot.slane %v2058_v42, 1  ;;  %v295_v56 = vor.u32 %v294_v38, %v293_v37  ;;  %v516_v57 = vrot.slane %v2007_v4, 4  ;;  %v238_v58 = vrot.slane %v2023_v18, 1  ;;  %v2143_v37 = vld [vmem:[%s2752_s1 + $0x3c] sm:$0xff]   ;;  %v1868_v38 = vld [vmem:[%s2753_s2 + $0x68] sm:$0xff]  }
  0x1c   :  { %v239_v59 = vrot.slane %v2034_v23, 1  ;;  %v237_v63 = vsel %vm228_vm2, %v235_v21, %v236_v29  ;;  %v2099_v2 = vshrl.u32 %v2034_v23, 16  ;;  %v405_v3 = vrot.slane %v2064_v45, 2 }
  0x1d   :  { %216 = vrot.lane.b32.xlu1 %v151_v35, %s1875_s10  ;;  %v406_v4 = vrot.slane %v2058_v42, 3  ;;  %v404_v6 = vsel %vm383_vm1, %v400_v39, %v403_v44  ;;  %v409_v7 = vrot.slane %v2067_v47, 3  ;;  %v297_v8 = vrot.slane %v2064_v45, 1  ;;  %1624 = vmatpush3.bf16.msra.mxu0 %v1865_v5  ;;  %v1869_v44 = vld [vmem:[%s2753_s2 + $0x28] sm:$0xff]  }
  0x1e   :  { %556 = vrot.lane.b32.xlu0 %v511_v36, %s1876_s13  ;;  %v408_v9 = vrot.slane %v2099_v2, 2  ;;  %v298_v11 = vrot.slane %v2058_v42, 2  ;;  %v296_v12 = vsel %vm269_vm3, %v290_v50, %v295_v56  ;;  %v465_v14 = vsel %vm456_vm0, %v463_v40, %v464_v41  ;;  %1625 = vmatprep.subr.bf16.mxu0 %v1866_v17 }
  0x1f   :  { %v302_v15 = vrot.slane %v2099_v2, 1  ;;  %v303_v16 = vrot.slane %v2067_v47, 2  ;;  %v158_v19 = vor.u32 %v157_v52, %v2064_v45  ;;  %v162_v20 = vrot.slane %v2067_v47, 1 }
  0x20   :  { %v514_v21 = vor.u32 %v513_v53, %v512_v48  ;;  %v517_v22 = vor.u32 %v516_v57, %v515_v54  ;;  %v407_v24 = vor.u32 %v406_v4, %v405_v3  ;;  %v410_v25 = vor.u32 %v409_v7, %v408_v9 }
  0x21   :  { %257 = vrot.lane.b32.xlu1 %v237_v63, %s1874_s9  ;;  %v2123_v26 = vshll.u32 %v2086_v60, 16  ;;  %v2126_v27 = vshll.u32 %v2091_v61, 16  ;;  %v240_v28 = vsel %vm228_vm2, %v238_v58, %v239_v59  ;;  %v299_v29 = vor.u32 %v298_v11, %v297_v8  ;;  %1626 = vmatpush3.bf16.msra.mxu0 %v1867_v32 }
  0x22   :  { %444 = vrot.lane.b32.xlu0 %v404_v6, %s1875_s10  ;;  %v466_v30 = vrot.slane %v2023_v18, 3  ;;  %v467_v31 = vrot.slane %v2034_v23, 3  ;;  %v304_v33 = vor.u32 %v303_v16, %v302_v15  ;;  %v2136_v34 = vshrl.u32 %v2086_v60, 16  ;;  %1627 = vmatprep.subr.bf16.mxu0 %v1868_v38 }
  0x23   :  { %v519_v35 = vrot.slane %v2064_v45, 3  ;;  %v520_v36 = vrot.slane %v2058_v42, 4  ;;  %v163_v39 = vsel %vm115_vm4, %v158_v19, %v162_v20  ;;  %v169_v40 = vrot.slane %v2123_v26, 1  ;;  %v1872_v20 = vld [vmem:[%s2753_s2 + $0x78] sm:$0xff]  }
  0x24   :  { %v522_v41 = vrot.slane %v2099_v2, 3  ;;  %v309_v42 = vshrl.u32 %v2091_v61, 16  ;;  %v518_v45 = vsel %vm497_vm5, %v514_v21, %v517_v22  ;;  %v411_v48 = vsel %vm383_vm1, %v407_v24, %v410_v25 }
  0x25   :  { %346 = vrot.lane.b32.xlu1 %v296_v12, %s1876_s13  ;;  %v174_v49 = vrot.slane %v2126_v27, 1  ;;  %v523_v50 = vrot.slane %v2067_v47, 4  ;;  %v412_v52 = vrot.slane %v2136_v34, 2  ;;  %v413_v53 = vrot.slane %v2123_v26, 3  ;;  %v1870_v47 = vld [vmem:[%s2753_s2 + $0x70] sm:$0xff]   ;;  %1628 = vmatpush3.bf16.msra.mxu0 %v1869_v44  ;;  %v2226_v44 = vld [vmem:[%s2752_s1 + $0x48] sm:$0xff]  }
  0x26   :  { %485 = vrot.lane.b32.xlu0 %v465_v14, %s1874_s9  ;;  %v415_v54 = vrot.slane %v309_v42, 2  ;;  %v416_v55 = vrot.slane %v2126_v27, 3  ;;  %v305_v56 = vsel %vm269_vm3, %v299_v29, %v304_v33  ;;  %v468_v57 = vsel %vm456_vm0, %v466_v30, %v467_v31  ;;  %v1871_v14 = vld [vmem:[%s2753_s2 + $0x30] sm:$0xff]   ;;  %1629 = vmatprep.subr.bf16.mxu0 %v1870_v47 }
  0x27   :  { %v521_v58 = vor.u32 %v520_v36, %v519_v35  ;;  %v241_v59 = vrot.slane %v2086_v60, 1  ;;  %v170_v62 = vor.u32 %v169_v40, %v2136_v34  ;;  %v242_v63 = vrot.slane %v2091_v61, 1 }
  0x28   :  { %v306_v2 = vrot.slane %v2136_v34, 1  ;;  %v307_v3 = vrot.slane %v2123_v26, 2  ;;  %v524_v4 = vor.u32 %v523_v50, %v522_v41  ;;  %v311_v5 = vrot.slane %v309_v42, 1 }
  0x29   :  { %218 = vrot.lane.b32.xlu1 %v163_v39, %s1875_s10  ;;  %v312_v6 = vrot.slane %v2126_v27, 2  ;;  %v2182_v7 = vshll.u32 %v2143_v37, 16  ;;  %v414_v8 = vor.u32 %v413_v53, %v412_v52  ;;  %v417_v9 = vor.u32 %v416_v55, %v415_v54  ;;  %1630 = vmatpush3.bf16.msra.mxu0 %v1871_v14 }
  0x2a   :  { %558 = vrot.lane.b32.xlu0 %v518_v45, %s1876_s13  ;;  %v2185_v11 = vshrl.u32 %v2143_v37, 16  ;;  %v2188_v12 = vshll.u32 %v2156_v43, 16  ;;  %v526_v16 = vrot.slane %v2136_v34, 3  ;;  %v527_v17 = vrot.slane %v2123_v26, 4  ;;  %1631 = vmatprep.subr.bf16.mxu0 %v1872_v20 }
  0x2b   :  { %v181_v15 = vrot.slane %v2182_v7, 1  ;;  %v529_v19 = vrot.slane %v309_v42, 3  ;;  %v308_v21 = vor.u32 %v307_v3, %v306_v2  ;;  %v469_v22 = vrot.slane %v2086_v60, 3 }
  0x2c   :  { %v470_v24 = vrot.slane %v2091_v61, 3  ;;  %v530_v25 = vrot.slane %v2126_v27, 4  ;;  %v186_v29 = vrot.slane %v2188_v12, 1  ;;  %v244_v26 = vrot.slane %v2143_v37, 1  ;;  %v1873_v27 = vld [vmem:[%s2753_s2 + $0x38] sm:$0xff]  }
  0x2d   :  { %259 = vrot.lane.b32.xlu1 %v240_v28, %s1874_s9  ;;  %v313_v28 = vor.u32 %v312_v6, %v311_v5  ;;  %v2207_v30 = vshrl.u32 %v2156_v43, 16  ;;  %v182_v31 = vor.u32 %v181_v15, %v2185_v11  ;;  %v419_v32 = vrot.slane %v2185_v11, 2  ;;  %1632 = vmatpush3.bf16.msra.mxu0 %v1873_v27 }
  0x2e   :  { %446 = vrot.lane.b32.xlu0 %v411_v48, %s1875_s10  ;;  %v420_v33 = vrot.slane %v2182_v7, 3  ;;  %v423_v34 = vrot.slane %v2188_v12, 3  ;;  %v528_v35 = vor.u32 %v527_v17, %v526_v16  ;;  %v531_v36 = vor.u32 %v530_v25, %v529_v19 }
  0x2f   :  { %v245_v38 = vrot.slane %v2156_v43, 1  ;;  %v422_v39 = vrot.slane %v2207_v30, 2  ;;  %v175_v40 = vsel %vm115_vm4, %v170_v62, %v174_v49  ;;  %v525_v41 = vsel %vm497_vm5, %v521_v58, %v524_v4  ;;  %v2235_v49 = vld [vmem:[%s2752_s1 + $0x50] ss:$0 sps:$4 sm:$0xff]  }
  0x30   :  { %v243_v42 = vsel %vm228_vm2, %v241_v59, %v242_v63  ;;  %v418_v45 = vsel %vm383_vm1, %v414_v8, %v417_v9  ;;  %v471_v48 = vsel %vm456_vm0, %v469_v22, %v470_v24  ;;  %v315_v50 = vrot.slane %v2185_v11, 1  ;;  %v2275_v22 = vld [vmem:[%s2752_s1 + $0x54] sm:$0xff]   ;;  %v2280_v24 = vld [vmem:[%s2752_s1 + $0x5c] ss:$0 sps:$4 sm:$0xff]  }
  0x31   :  { %348 = vrot.lane.b32.xlu1 %v305_v56, %s1876_s13  ;;  %v316_v52 = vrot.slane %v2182_v7, 2  ;;  %v421_v53 = vor.u32 %v420_v33, %v419_v32  ;;  %v424_v54 = vor.u32 %v423_v34, %v422_v39  ;;  %v320_v55 = vrot.slane %v2207_v30, 1 }
  0x32   :  { %487 = vrot.lane.b32.xlu0 %v468_v57, %s1874_s9  ;;  %v321_v56 = vrot.slane %v2188_v12, 2  ;;  %v314_v57 = vsel %vm269_vm3, %v308_v21, %v313_v28  ;;  %v187_v58 = vsel %vm115_vm4, %v182_v31, %v186_v29  ;;  %v532_v59 = vsel %vm497_vm5, %v528_v35, %v531_v36 }
  0x33   :  { %v2244_v47 = vsel %vm228_vm2, %v244_v26, %v245_v38  ;;  %v472_v62 = vrot.slane %v2143_v37, 3  ;;  %v473_v63 = vrot.slane %v2156_v43, 3  ;;  %v2250_v2 = vshrl.u32 %v2226_v44, 16 }
  0x34   :  { %v2253_v3 = vshll.u32 %v2226_v44, 16  ;;  %v317_v4 = vor.u32 %v316_v52, %v315_v50  ;;  %v2256_v5 = vshll.u32 %v2235_v49, 16  ;;  %v247_v6 = vrot.slane %v2226_v44, 1 }
  0x35   :  { %220 = vrot.lane.b32.xlu1 %v175_v40, %s1875_s10  ;;  %v248_v8 = vrot.slane %v2235_v49, 1  ;;  %v2261_v9 = vsel %vm383_vm1, %v421_v53, %v424_v54  ;;  %v322_v14 = vor.u32 %v321_v56, %v320_v55  ;;  %v327_v15 = vshrl.u32 %v2235_v49, 16 }
  0x36   :  { %560 = vrot.lane.b32.xlu0 %v525_v41, %s1876_s13  ;;  %v426_v16 = vrot.slane %v2250_v2, 2  ;;  %v533_v17 = vrot.slane %v2185_v11, 3  ;;  %v427_v20 = vrot.slane %v2253_v3, 3  ;;  %v430_v21 = vrot.slane %v2256_v5, 3 }
  0x37   :  { %v2268_v19 = vsel %vm228_vm2, %v247_v6, %v248_v8  ;;  %v193_v25 = vrot.slane %v2253_v3, 1  ;;  %v429_v28 = vrot.slane %v327_v15, 2  ;;  %v324_v29 = vrot.slane %v2250_v2, 1 }
  0x38   :  { %v325_v26 = vrot.slane %v2253_v3, 2  ;;  %v198_v31 = vrot.slane %v2256_v5, 1  ;;  %v428_v32 = vor.u32 %v427_v20, %v426_v16  ;;  %v329_v33 = vrot.slane %v327_v15, 1 }
  0x39   :  { %261 = vrot.lane.b32.xlu1 %v243_v42, %s1874_s9  ;;  %v330_v34 = vrot.slane %v2256_v5, 2  ;;  %v534_v27 = vrot.slane %v2182_v7, 4  ;;  %v536_v35 = vrot.slane %v2207_v30, 3  ;;  %v431_v36 = vor.u32 %v430_v21, %v429_v28 }
  0x3a   :  { %448 = vrot.lane.b32.xlu0 %v418_v45, %s1875_s10  ;;  %v326_v38 = vor.u32 %v325_v26, %v324_v29  ;;  %v201_v40 = vshrl.u32 %v2275_v22, 16  ;;  %v203_v41 = vshll.u32 %v2275_v22, 16  ;;  %v208_v42 = vshll.u32 %v2280_v24, 16 }
  0x3b   :  { %v331_v39 = vor.u32 %v330_v34, %v329_v33  ;;  %v537_v45 = vrot.slane %v2188_v12, 4  ;;  %v2297_v50 = vsel %vm383_vm1, %v428_v32, %v431_v36  ;;  %v540_v7 = vrot.slane %v2250_v2, 3 }
  0x3c   :  { %v541_v30 = vrot.slane %v2253_v3, 4  ;;  %v205_v53 = vrot.slane %v203_v41, 1  ;;  %v210_v54 = vrot.slane %v208_v42, 1  ;;  %v543_v55 = vrot.slane %v327_v15, 3 }
  0x3d   :  { %350 = vrot.lane.b32.xlu1 %v314_v57, %s1876_s13  ;;  %v2302_v52 = vsel %vm269_vm3, %v326_v38, %v331_v39  ;;  %v544_v57 = vrot.slane %v2256_v5, 4  ;;  %v251_v12 = vrot.slane %v2280_v24, 1  ;;  %v336_v8 = vshrl.u32 %v2280_v24, 16 }
  0x3e   :  { %489 = vrot.lane.b32.xlu0 %v471_v48, %s1874_s9  ;;  %v542_v56 = vor.u32 %v541_v30, %v540_v7  ;;  %v250_v48 = vrot.slane %v2275_v22, 1  ;;  %v206_v6 = vor.u32 %v205_v53, %v201_v40  ;;  %v433_v16 = vrot.slane %v201_v40, 2 }
  0x3f   :  { %v434_v3 = vrot.slane %v203_v41, 3  ;;  %v545_v20 = vor.u32 %v544_v57, %v543_v55  ;;  %v437_v15 = vrot.slane %v208_v42, 3  ;;  %v333_v28 = vrot.slane %v201_v40, 1 }
  0x40   :  { %v252_v21 = vsel %vm228_vm2, %v250_v48, %v251_v12  ;;  %v211_v29 = vsel %vm115_vm4, %v206_v6, %v210_v54  ;;  %v436_v32 = vrot.slane %v336_v8, 2  ;;  %v334_v33 = vrot.slane %v203_v41, 2 }
  0x41   :  { %222 = vrot.lane.b32.xlu1 %v187_v58, %s1875_s10  ;;  %v435_v26 = vor.u32 %v434_v3, %v433_v16  ;;  %v323_v34 = vsel %vm269_vm3, %v317_v4, %v322_v14  ;;  %v546_v58 = vsel %vm497_vm5, %v542_v56, %v545_v20  ;;  %v338_v36 = vrot.slane %v336_v8, 1 }
  0x42   :  { %562 = vrot.lane.b32.xlu0 %v532_v59, %s1876_s13  ;;  %v339_v38 = vrot.slane %v208_v42, 2  ;;  %v194_v59 = vor.u32 %v193_v25, %v2250_v2  ;;  %v438_v39 = vor.u32 %v437_v15, %v436_v32  ;;  %v335_v7 = vor.u32 %v334_v33, %v333_v28 }
  0x43   :  { %v547_v30 = vrot.slane %v201_v40, 3  ;;  %v548_v54 = vrot.slane %v203_v41, 4  ;;  %v550_v55 = vrot.slane %v336_v8, 3  ;;  %v551_v57 = vrot.slane %v208_v42, 4 }
  0x44   :  { %v340_v53 = vor.u32 %v339_v38, %v338_v36  ;;  %v474_v4 = vsel %vm456_vm0, %v472_v62, %v473_v63  ;;  %v538_v2 = vor.u32 %v537_v45, %v536_v35  ;;  %v439_v14 = vsel %vm383_vm1, %v435_v26, %v438_v39 }
  0x45   :  { %263 = vrot.lane.b32.xlu1 %v2244_v47, %s1874_s9  ;;  %v535_v47 = vor.u32 %v534_v27, %v533_v17  ;;  %v549_v40 = vor.u32 %v548_v54, %v547_v30  ;;  %v199_v41 = vsel %vm115_vm4, %v194_v59, %v198_v31  ;;  %v377_v63 = vrot.slane %v2226_v44, 2 }
  0x46   :  { %450 = vrot.lane.b32.xlu0 %v2261_v9, %s1875_s10  ;;  %v341_v25 = vsel %vm269_vm3, %v335_v7, %v340_v53  ;;  %v552_v9 = vor.u32 %v551_v57, %v550_v55  ;;  %v378_v17 = vrot.slane %v2235_v49, 2  ;;  %vm358_vm6 = vcmask 1045504  }
  0x47   :  { %v539_v11 = vsel %vm497_vm5, %v535_v47, %v538_v2  ;;  %v380_v27 = vrot.slane %v2275_v22, 2  ;;  %v381_v35 = vrot.slane %v2280_v24, 2  ;;  %v475_v5 = vrot.slane %v2226_v44, 3 }
  0x48   :  { %v553_v62 = vsel %vm497_vm5, %v549_v40, %v552_v9  ;;  %v476_v31 = vrot.slane %v2235_v49, 3  ;;  %v2344_v42 = vsel %vm358_vm6, %v377_v63, %v378_v17  ;;  %v478_v49 = vrot.slane %v2275_v22, 3 }
  0x49   :  { %352 = vrot.lane.b32.xlu1 %v323_v34, %s1876_s13  ;;  %v2347_v45 = vsel %vm358_vm6, %v380_v27, %v381_v35  ;;  %v479_v48 = vrot.slane %v2280_v24, 3  ;;  %v360_v12 = vrot.slane %v1931_v1, 2  ;;  %vm570_vm7 = vcmask 261120  }
  0x4a   :  { %491 = vrot.lane.b32.xlu0 %v474_v4, %s1874_s9  ;;  %v477_v56 = vsel %vm456_vm0, %v475_v5, %v476_v31  ;;  %vm587_vm8 = vcmask 523264   ;;  %vm604_vm9 = vcmask 785408   ;;  %v363_v36 = vrot.slane %v1951_v13, 2 }
  0x4b   :  { %v366_v2 = vrot.slane %v1977_v46, 2  ;;  %v369_v31 = vrot.slane %v2034_v23, 2  ;;  %vm925_vm10 = vcmask 113664   ;;  %vm1055_vm11 = vcmask 105472  }
  0x4c   :  { %vm1185_vm12 = vcmask 97280   ;;  %vm1881_vm13 = vmmov 0   ;;  %vm1399_vm5 = vcmask 1041409  }
  0x4d   :  { %224 = vrot.lane.b32.xlu1 %v199_v41, %s1875_s10 }
  0x4e   :  { %564 = vrot.lane.b32.xlu0 %v539_v11, %s1876_s13 }
  0x51   :  { %265 = vrot.lane.b32.xlu1 %v2268_v19, %s1874_s9  ;;  %v480_v19 = vsel %vm456_vm0, %v478_v49, %v479_v48 }
  0x52   :  { %452 = vrot.lane.b32.xlu0 %v2297_v50, %s1875_s10  ;;  %v918_v50 = vld [vmem:[%s2754_s0] sm:$0xff] }
  0x55   :  { %354 = vrot.lane.b32.xlu1 %v2302_v52, %s1876_s13  ;;  %v359_v52 = vrot.slane %v1926_v0, 2 }
  0x56   :  { %493 = vrot.lane.b32.xlu0 %v477_v56, %s1874_s9 }
  0x57   :  { %v361_v16 = vsel %vm358_vm6, %v359_v52, %v360_v12 }
  0x59   :  { %226 = vrot.lane.b32.xlu1 %v211_v29, %s1875_s10 }
  0x5a   :  { %566 = vrot.lane.b32.xlu0 %v546_v58, %s1876_s13  ;;  %v362_v58 = vrot.slane %v1944_v10, 2 }
  0x5c   :  { %v364_v39 = vsel %vm358_vm6, %v362_v58, %v363_v36 }
  0x5d   :  { %267 = vrot.lane.b32.xlu1 %v252_v21, %s1874_s9 }
  0x5e   :  { %454 = vrot.lane.b32.xlu0 %v439_v14, %s1875_s10 }
  0x61   :  { %356 = vrot.lane.b32.xlu1 %v341_v25, %s1876_s13 }
  0x62   :  { %495 = vrot.lane.b32.xlu0 %v480_v19, %s1874_s9 }
  0x65   :  { %1052 = vrot.lane.b32.xlu1 %v918_v50, %s1877_s28 }
  0x66   :  { %568 = vrot.lane.b32.xlu0 %v553_v62, %s1876_s13 }
  0x6a   :  { %922 = vrot.lane.b32.xlu0 %v918_v50, %s1878_s29 }
  0x6e   :  { %1182 = vrot.lane.b32.xlu0 %v918_v50, %s1879_s30 }
  0x77   :  { %v482_v24 = vpop.permute.xlu1 %481 }
  0x7b   :  { %v254_v6 = vpop.permute.xlu1 %253 }
  0x7c   :  { %v441_v8 = vpop.permute.xlu0 %440 }
  0x7d   :  { %v631_v21 = vsel %vm570_vm7, %v361_v16, %v441_v8 }
  0x7e   :  { %v654_v1 = vsel %vm587_vm8, %v631_v21, %v482_v24 }
  0x7f   :  { %v343_v3 = vpop.permute.xlu1 %342 }
  0x80   :  { %v213_v20 = vpop.permute.xlu0 %212 }
  0x81   :  { %v572_v15 = vsel %vm570_vm7, %v1926_v0, %v213_v20  ;;  %v372_v20 = vrot.slane %v2091_v61, 2 }
  0x82   :  { %v589_v29 = vsel %vm587_vm8, %v572_v15, %v254_v6 }
  0x83   :  { %v215_v28 = vpop.permute.xlu1 %214  ;;  %v606_v33 = vsel %vm604_vm9, %v589_v29, %v343_v3 }
  0x84   :  { %v555_v26 = vpop.permute.xlu0 %554  ;;  %v574_v59 = vsel %vm570_vm7, %v1944_v10, %v215_v28  ;;  %v365_v10 = vrot.slane %v1986_v51, 2 }
  0x85   :  { %v670_v32 = vsel %vm604_vm9, %v654_v1, %v555_v26 }
  0x86   :  { %853 = vmatprep.mubr.bf16.mxu0 %v670_v32  ;;  %v367_v9 = vsel %vm358_vm6, %v365_v10, %v366_v2 }
  0x87   :  { %854 = vmatmul.mubr.bf16.vlgmr.msra.gmra.mrb[0].mxu0 %v606_v33  ;;  %v256_v34 = vpop.permute.xlu1 %255 }
  0x88   :  { %v443_v0 = vpop.permute.xlu0 %442  ;;  %v591_v30 = vsel %vm587_vm8, %v574_v59, %v256_v34 }
  0x89   :  { %v634_v53 = vsel %vm570_vm7, %v364_v39, %v443_v0 }
  0x8b   :  { %v345_v38 = vpop.permute.xlu1 %344 }
  0x8c   :  { %v484_v7 = vpop.permute.xlu0 %483  ;;  %v609_v13 = vsel %vm604_vm9, %v591_v30, %v345_v38  ;;  %v375_v38 = vrot.slane %v2156_v43, 2 }
  0x8d   :  { %v656_v55 = vsel %vm587_vm8, %v634_v53, %v484_v7 }
  0x8f   :  { %v217_v54 = vpop.permute.xlu1 %216 }
  0x90   :  { %v557_v57 = vpop.permute.xlu0 %556  ;;  %v576_v40 = vsel %vm570_vm7, %v1986_v51, %v217_v54  ;;  %v368_v51 = vrot.slane %v2023_v18, 2 }
  0x91   :  { %v673_v4 = vsel %vm604_vm9, %v656_v55, %v557_v57 }
  0x92   :  { %861 = vmatprep.mubr.bf16.mxu0 %v673_v4  ;;  %v370_v19 = vsel %vm358_vm6, %v368_v51, %v369_v31 }
  0x93   :  { %862 = vmatmul.mubr.bf16.gmra.mrb[4].mxu0 %v609_v13  ;;  %v258_v47 = vpop.permute.xlu1 %257 }
  0x94   :  { %v445_v14 = vpop.permute.xlu0 %444  ;;  %v593_v62 = vsel %vm587_vm8, %v576_v40, %v258_v47 }
  0x95   :  { %v637_v11 = vsel %vm570_vm7, %v367_v9, %v445_v14 }
  0x97   :  { %v347_v25 = vpop.permute.xlu1 %346 }
  0x98   :  { %v486_v41 = vpop.permute.xlu0 %485  ;;  %v612_v46 = vsel %vm604_vm9, %v593_v62, %v347_v25 }
  0x99   :  { %v658_v17 = vsel %vm587_vm8, %v637_v11, %v486_v41 }
  0x9b   :  { %v219_v63 = vpop.permute.xlu1 %218 }
  0x9c   :  { %v559_v27 = vpop.permute.xlu0 %558  ;;  %v578_v48 = vsel %vm570_vm7, %v2023_v18, %v219_v63  ;;  %v371_v18 = vrot.slane %v2086_v60, 2 }
  0x9d   :  { %v676_v35 = vsel %vm604_vm9, %v658_v17, %v559_v27 }
  0x9e   :  { %869 = vmatprep.mubr.bf16.mxu0 %v676_v35  ;;  %v373_v29 = vsel %vm358_vm6, %v371_v18, %v372_v20 }
  0x9f   :  { %870 = vmatmul.mubr.bf16.gmra.mrb[8].mxu0 %v612_v46  ;;  %v260_v5 = vpop.permute.xlu1 %259  ;;  %v919_v46 = vlaneseq }
  0xa0   :  { %v447_v56 = vpop.permute.xlu0 %446  ;;  %v595_v24 = vsel %vm587_vm8, %v578_v48, %v260_v5 }
  0xa1   :  { %v640_v52 = vsel %vm570_vm7, %v370_v19, %v447_v56  ;;  %v2441_v51 = vshrl.u32 %v919_v46, 7 }
  0xa3   :  { %v349_v49 = vpop.permute.xlu1 %348 }
  0xa4   :  { %v488_v50 = vpop.permute.xlu0 %487  ;;  %v615_v23 = vsel %vm604_vm9, %v595_v24, %v349_v49 }
  0xa5   :  { %v660_v6 = vsel %vm587_vm8, %v640_v52, %v488_v50  ;;  %v943_v52 = vsub.s32 1, %v2441_v51 }
  0xa7   :  { %v221_v12 = vpop.permute.xlu1 %220 }
  0xa8   :  { %v561_v8 = vpop.permute.xlu0 %560  ;;  %v580_v28 = vsel %vm570_vm7, %v2086_v60, %v221_v12  ;;  %v374_v60 = vrot.slane %v2143_v37, 2 }
  0xa9   :  { %v679_v16 = vsel %vm604_vm9, %v660_v6, %v561_v8  ;;  %v954_v8 = vsub.s32 2, %v2441_v51 }
  0xaa   :  { %877 = vmatprep.mubr.bf16.mxu0 %v679_v16  ;;  %v376_v30 = vsel %vm358_vm6, %v374_v60, %v375_v38  ;;  %vm1401_vm6 = vcmask 1042434  }
  0xab   :  { %878 = vmatmul.mubr.bf16.gmra.mrb[12].mxu0 %v615_v23  ;;  %v262_v3 = vpop.permute.xlu1 %261 }
  0xac   :  { %v449_v21 = vpop.permute.xlu0 %448  ;;  %v597_v1 = vsel %vm587_vm8, %v580_v28, %v262_v3  ;;  %v965_v3 = vsub.s32 3, %v2441_v51  ;;  %v976_v28 = vsub.s32 4, %v2441_v51 }
  0xad   :  { %v643_v32 = vsel %vm570_vm7, %v373_v29, %v449_v21 }
  0xaf   :  { %v351_v15 = vpop.permute.xlu1 %350 }
  0xb0   :  { %v490_v26 = vpop.permute.xlu0 %489  ;;  %v618_v61 = vsel %vm604_vm9, %v597_v1, %v351_v15  ;;  %v2460_v1 = vsub.s32 5, %v2441_v51 }
  0xb1   :  { %v662_v34 = vsel %vm587_vm8, %v643_v32, %v490_v26 }
  0xb3   :  { %v223_v33 = vpop.permute.xlu1 %222 }
  0xb4   :  { %v563_v58 = vpop.permute.xlu0 %562  ;;  %v582_v7 = vsel %vm570_vm7, %v2143_v37, %v223_v33 }
  0xb5   :  { %v682_v36 = vsel %vm604_vm9, %v662_v34, %v563_v58 }
  0xb6   :  { %885 = vmatprep.mubr.bf16.mxu0 %v682_v36 }
  0xb7   :  { %886 = vmatmul.mubr.bf16.gmra.mrb[16].mxu0 %v618_v61  ;;  %v264_v0 = vpop.permute.xlu1 %263 }
  0xb8   :  { %v451_v59 = vpop.permute.xlu0 %450  ;;  %v599_v54 = vsel %vm587_vm8, %v582_v7, %v264_v0  ;;  %v998_v0 = vsub.s32 6, %v2441_v51 }
  0xb9   :  { %v646_v55 = vsel %vm570_vm7, %v376_v30, %v451_v59 }
  0xbb   :  { %v353_v39 = vpop.permute.xlu1 %352 }
  0xbc   :  { %v492_v53 = vpop.permute.xlu0 %491  ;;  %v621_v43 = vsel %vm604_vm9, %v599_v54, %v353_v39  ;;  %v1009_v39 = vsub.s32 7, %v2441_v51 }
  0xbd   :  { %v664_v4 = vsel %vm587_vm8, %v646_v55, %v492_v53  ;;  %v1368_v55 = vld [vmem:[%s2755_s3] sm:$0xff] }
  0xbf   :  { %v225_v57 = vpop.permute.xlu1 %224 }
  0xc0   :  { %v565_v13 = vpop.permute.xlu0 %564  ;;  %v584_v14 = vsel %vm570_vm7, %v2226_v44, %v225_v57  ;;  %v1369_v57 = vld [vmem:[%s2755_s3 + $0x8] sm:$0xff] }
  0xc1   :  { %v685_v47 = vsel %vm604_vm9, %v664_v4, %v565_v13  ;;  %v1786_v4 = vpack.c.bf16 %v1369_v57, %v1368_v55 }
  0xc2   :  { %893 = vmatprep.mubr.bf16.mxu0 %v685_v47  ;;  %v1880_v47 = vmov 0.0|0.0  }
  0xc3   :  { %894 = vmatmul.mubr.bf16.gmra.mrb[20].mxu0 %v621_v43  ;;  %v266_v10 = vpop.permute.xlu1 %265  ;;  %1785 = vmatprep.subr.bf16.mxu1 %v1880_v47  ;;  %v1370_v43 = vld [vmem:[%s2755_s3 + $0x10] sm:$0xff] }
  0xc4   :  { %v453_v2 = vpop.permute.xlu0 %452  ;;  %v601_v40 = vsel %vm587_vm8, %v584_v14, %v266_v10  ;;  %1787 = vmatpush3.bf16.msra.mxu1 %v1786_v4  ;;  %v1371_v10 = vld [vmem:[%s2755_s3 + $0x18] sm:$0xff]  ;;  %v1372_v14 = vld [vmem:[%s2755_s3 + $0x20] sm:$0xff] }
  0xc5   :  { %v649_v9 = vsel %vm570_vm7, %v2344_v42, %v453_v2  ;;  %1788 = vmatprep.subr.bf16.mxu1 %v1880_v47  ;;  %v1789_v2 = vpack.c.bf16 %v1371_v10, %v1370_v43 }
  0xc7   :  { %v355_v37 = vpop.permute.xlu1 %354 }
  0xc8   :  { %v494_v25 = vpop.permute.xlu0 %493  ;;  %v624_v17 = vsel %vm604_vm9, %v601_v40, %v355_v37  ;;  %1790 = vmatpush3.bf16.msra.mxu1 %v1789_v2 }
  0xc9   :  { %v666_v62 = vsel %vm587_vm8, %v649_v9, %v494_v25  ;;  %v1373_v25 = vld [vmem:[%s2755_s3 + $0x28] sm:$0xff]  ;;  %1791 = vmatprep.subr.bf16.mxu1 %v1880_v47 }
  0xca   :  { %v1792_v40 = vpack.c.bf16 %v1373_v25, %v1372_v14 }
  0xcb   :  { %v227_v41 = vpop.permute.xlu1 %226 }
  0xcc   :  { %v567_v11 = vpop.permute.xlu0 %566  ;;  %v586_v44 = vsel %vm570_vm7, %v2275_v22, %v227_v41  ;;  %v932_v22 = vsub.s32 0, %v2441_v51  ;;  %1793 = vmatpush3.bf16.msra.mxu1 %v1792_v40  ;;  %v1374_v41 = vld [vmem:[%s2755_s3 + $0x30] sm:$0xff]  ;;  %v1379_v51 = vld [vmem:[%s2755_s3 + $0x58] sm:$0xff] }
  0xcd   :  { %v688_v63 = vsel %vm604_vm9, %v666_v62, %v567_v11  ;;  %v1375_v62 = vld [vmem:[%s2755_s3 + $0x38] sm:$0xff]  ;;  %1794 = vmatprep.subr.bf16.mxu1 %v1880_v47 }
  0xce   :  { %901 = vmatprep.mubr.bf16.mxu0 %v688_v63  ;;  %v1795_v11 = vpack.c.bf16 %v1375_v62, %v1374_v41 }
  0xcf   :  { %902 = vmatmul.mubr.bf16.gmra.mrb[24].mxu0 %v624_v17  ;;  %v268_v35 = vpop.permute.xlu1 %267  ;;  %v1376_v17 = vld [vmem:[%s2755_s3 + $0x40] sm:$0xff] }
  0xd0   :  { %v455_v27 = vpop.permute.xlu0 %454  ;;  %v603_v42 = vsel %vm587_vm8, %v586_v44, %v268_v35  ;;  %1796 = vmatpush3.bf16.msra.mxu1 %v1795_v11 }
  0xd1   :  { %v652_v31 = vsel %vm570_vm7, %v2347_v45, %v455_v27  ;;  %v1377_v27 = vld [vmem:[%s2755_s3 + $0x48] sm:$0xff]  ;;  %1797 = vmatprep.subr.bf16.mxu1 %v1880_v47  ;;  %vm1403_vm7 = vcmask 1043459  }
  0xd2   :  { %v1798_v35 = vpack.c.bf16 %v1377_v27, %v1376_v17 }
  0xd3   :  { %v357_v56 = vpop.permute.xlu1 %356 }
  0xd4   :  { %v496_v5 = vpop.permute.xlu0 %495  ;;  %v627_v50 = vsel %vm604_vm9, %v603_v42, %v357_v56  ;;  %1799 = vmatpush3.bf16.msra.mxu1 %v1798_v35  ;;  %v1380_v42 = vld [vmem:[%s2755_s3 + $0x60] sm:$0xff]  ;;  %v1381_v56 = vld [vmem:[%s2755_s3 + $0x68] sm:$0xff] }
  0xd5   :  { %v668_v49 = vsel %vm587_vm8, %v652_v31, %v496_v5  ;;  %v1378_v5 = vld [vmem:[%s2755_s3 + $0x50] sm:$0xff]  ;;  %1800 = vmatprep.subr.bf16.mxu1 %v1880_v47  ;;  %vm1405_vm8 = vcmask 1044484  }
  0xd6   :  { %v1801_v31 = vpack.c.bf16 %v1379_v51, %v1378_v5 }
  0xd7   :  { %v1053_v23 = vpop.permute.xlu1 %1052 }
  0xd8   :  { %v569_v48 = vpop.permute.xlu0 %568  ;;  %v2453_v18 = vsel %vm1055_vm11, %v1053_v23, -1e+30  ;;  %1802 = vmatpush3.bf16.msra.mxu1 %v1801_v31  ;;  %vm1411_vm11 = vcmask 1047559  }
  0xd9   :  { %v691_v19 = vsel %vm604_vm9, %v668_v49, %v569_v48  ;;  %v1063_v21 = vrot.slane %v2453_v18, %v932_v22  ;;  %v1074_v15 = vrot.slane %v2453_v18, %v943_v52  ;;  %v1085_v26 = vrot.slane %v2453_v18, %v954_v8  ;;  %1803 = vmatprep.subr.bf16.mxu1 %v1880_v47 }
  0xda   :  { %909 = vmatprep.mubr.bf16.mxu0 %v691_v19  ;;  %v1096_v58 = vrot.slane %v2453_v18, %v965_v3  ;;  %v1107_v38 = vrot.slane %v2453_v18, %v976_v28  ;;  %v1118_v30 = vrot.slane %v2453_v18, %v2460_v1  ;;  %v1129_v54 = vrot.slane %v2453_v18, %v998_v0  ;;  %v1382_v19 = vld [vmem:[%s2755_s3 + $0x70] sm:$0xff] }
  0xdb   :  { %910 = vmatmul.mubr.bf16.gmra.mrb[28].mxu0 %v627_v50  ;;  %v1140_v37 = vrot.slane %v2453_v18, %v1009_v39  ;;  %v1882_v49 = vmov 0.0   ;;  %v1804_v48 = vpack.c.bf16 %v1381_v56, %v1380_v42  ;;  %v1383_v50 = vld [vmem:[%s2755_s3 + $0x78] sm:$0xff]  ;;  %vm1407_vm9 = vcmask 1045509  }
  0xdc   :  { %v923_v24 = vpop.permute.xlu0 %922  ;;  %1747 = vmatprep.mubr.msk.f32.mxu1 %vm1881_vm13, %v1882_v49 }
  0xdd   :  { %v926_v12 = vsel %vm925_vm10, %v923_v24, -1e+30  ;;  %1805 = vmatpush3.bf16.msra.mxu1 %v1804_v48  ;;  %v2542_v24 = vand.u32 127, %v919_v46  ;;  %vm1409_vm10 = vcmask 1046534  }
  0xde   :  { %v933_v6 = vrot.slane %v926_v12, %v932_v22  ;;  %v944_v45 = vrot.slane %v926_v12, %v943_v52  ;;  %v955_v16 = vrot.slane %v926_v12, %v954_v8  ;;  %v966_v20 = vrot.slane %v926_v12, %v965_v3  ;;  %1806 = vmatprep.subr.bf16.mxu1 %v1880_v47 }
  0xdf   :  { %v977_v29 = vrot.slane %v926_v12, %v976_v28  ;;  %v988_v32 = vrot.slane %v926_v12, %v2460_v1  ;;  %v999_v60 = vrot.slane %v926_v12, %v998_v0  ;;  %v1010_v7 = vrot.slane %v926_v12, %v1009_v39 }
  0xe0   :  { %939 = vbcast.lane.b32.xlu0 %v933_v6, 264  ;;  %935 = vbcast.lane.b32.xlu1 %v933_v6, 256  ;;  %v1183_v33 = vpop.permute.xlu0 %1182  ;;  %vm928_vm14 = vcmp.lt.s32.totalorder %v2542_v24, 8  ;;  %vm1057_vm15 = vcmp.ge.s32.totalorder %v2542_v24, 8  ;;  %vm1058_vm0 = vcmp.lt.s32.totalorder %v2542_v24, 16  ;;  %vm1187_vm2 = vcmp.ge.s32.totalorder %v2542_v24, 16 }
  0xe1   :  { %v2463_v34 = vsel %vm1185_vm12, %v1183_v33, -1e+30  ;;  %vm2567_vm1 = vmand %vm1057_vm15, %vm1058_vm0  ;;  %vm1188_vm3 = vcmp.lt.s32.totalorder %v2542_v24, 24 }
  0xe2   :  { %v1193_v36 = vrot.slane %v2463_v34, %v932_v22  ;;  %v1204_v61 = vrot.slane %v2463_v34, %v943_v52  ;;  %v1215_v59 = vrot.slane %v2463_v34, %v954_v8  ;;  %v1226_v53 = vrot.slane %v2463_v34, %v965_v3  ;;  %vm2591_vm4 = vmand %vm1187_vm2, %vm1188_vm3 }
  0xe3   :  { %v1237_v13 = vrot.slane %v2463_v34, %v976_v28  ;;  %v1248_v9 = vrot.slane %v2463_v34, %v2460_v1  ;;  %v1259_v63 = vrot.slane %v2463_v34, %v998_v0  ;;  %v1270_v44 = vrot.slane %v2463_v34, %v1009_v39 }
  0xe4   :  { %950 = vbcast.lane.b32.xlu0 %v944_v45, 264  ;;  %946 = vbcast.lane.b32.xlu1 %v944_v45, 256  ;;  %v1807_v22 = vpack.c.bf16 %v1383_v50, %v1382_v19 }
  0xe6   :  { %1808 = vmatpush3.bf16.msra.mxu1 %v1807_v22 }
  0xe7   :  { %1809 = vmatprep.subr.bf16.mxu1 %v1880_v47 }
  0xe8   :  { %961 = vbcast.lane.b32.xlu0 %v955_v16, 264  ;;  %957 = vbcast.lane.b32.xlu1 %v955_v16, 256 }
  0xec   :  { %972 = vbcast.lane.b32.xlu0 %v966_v20, 264  ;;  %968 = vbcast.lane.b32.xlu1 %v966_v20, 256 }
  0xf0   :  { %1069 = vbcast.lane.b32.xlu0 %v1063_v21, 264  ;;  %1065 = vbcast.lane.b32.xlu1 %v1063_v21, 256 }
  0xf4   :  { %1080 = vbcast.lane.b32.xlu0 %v1074_v15, 264  ;;  %1076 = vbcast.lane.b32.xlu1 %v1074_v15, 256 }
  0xf8   :  { %983 = vbcast.lane.b32.xlu0 %v977_v29, 264  ;;  %979 = vbcast.lane.b32.xlu1 %v977_v29, 256 }
  0xfc   :  { %1091 = vbcast.lane.b32.xlu0 %v1085_v26, 264  ;;  %1087 = vbcast.lane.b32.xlu1 %v1085_v26, 256 }
 0x100   :  { %994 = vbcast.lane.b32.xlu0 %v988_v32, 264  ;;  %990 = vbcast.lane.b32.xlu1 %v988_v32, 256 }
 0x104   :  { %1102 = vbcast.lane.b32.xlu0 %v1096_v58, 264  ;;  %1098 = vbcast.lane.b32.xlu1 %v1096_v58, 256 }
 0x108   :  { %1199 = vbcast.lane.b32.xlu0 %v1193_v36, 264  ;;  %1195 = vbcast.lane.b32.xlu1 %v1193_v36, 256 }
 0x10c   :  { %1210 = vbcast.lane.b32.xlu0 %v1204_v61, 264  ;;  %1206 = vbcast.lane.b32.xlu1 %v1204_v61, 256 }
 0x110   :  { %1005 = vbcast.lane.b32.xlu0 %v999_v60, 264  ;;  %1001 = vbcast.lane.b32.xlu1 %v999_v60, 256 }
 0x114   :  { %1113 = vbcast.lane.b32.xlu0 %v1107_v38, 264  ;;  %1109 = vbcast.lane.b32.xlu1 %v1107_v38, 256 }
 0x118   :  { %1221 = vbcast.lane.b32.xlu0 %v1215_v59, 264  ;;  %1217 = vbcast.lane.b32.xlu1 %v1215_v59, 256 }
 0x11c   :  { %1016 = vbcast.lane.b32.xlu0 %v1010_v7, 264  ;;  %1012 = vbcast.lane.b32.xlu1 %v1010_v7, 256 }
 0x120   :  { %1124 = vbcast.lane.b32.xlu0 %v1118_v30, 264  ;;  %1120 = vbcast.lane.b32.xlu1 %v1118_v30, 256 }
 0x124   :  { %1232 = vbcast.lane.b32.xlu0 %v1226_v53, 264  ;;  %1228 = vbcast.lane.b32.xlu1 %v1226_v53, 256 }
 0x128   :  { %1135 = vbcast.lane.b32.xlu0 %v1129_v54, 264  ;;  %1131 = vbcast.lane.b32.xlu1 %v1129_v54, 256 }
 0x12c   :  { %1243 = vbcast.lane.b32.xlu0 %v1237_v13, 264  ;;  %1239 = vbcast.lane.b32.xlu1 %v1237_v13, 256 }
 0x130   :  { %1146 = vbcast.lane.b32.xlu0 %v1140_v37, 264  ;;  %1142 = vbcast.lane.b32.xlu1 %v1140_v37, 256 }
 0x134   :  { %1254 = vbcast.lane.b32.xlu0 %v1248_v9, 264  ;;  %1250 = vbcast.lane.b32.xlu1 %v1248_v9, 256 }
 0x138   :  { %1265 = vbcast.lane.b32.xlu0 %v1259_v63, 264  ;;  %1261 = vbcast.lane.b32.xlu1 %v1259_v63, 256 }
 0x13c   :  { %1276 = vbcast.lane.b32.xlu0 %v1270_v44, 264  ;;  %1272 = vbcast.lane.b32.xlu1 %v1270_v44, 256 }
 0x152   :  { %v936_v52 = vpop.permute.xlu1 %935  ;;  %v940_v12 = vpop.permute.xlu0 %939 }
 0x153   :  { %v1020_v6 = vsel %vm928_vm14, %v936_v52, 0.0  ;;  %v1021_v45 = vsel %vm928_vm14, %v940_v12, 0.0  ;;  %v1486_v12 = vld [vmem:[%s2756_s5 + $0x8] sm:$0xff] }
 0x156   :  { %v947_v8 = vpop.permute.xlu1 %946  ;;  %v951_v16 = vpop.permute.xlu0 %950 }
 0x157   :  { %v1022_v23 = vsel %vm928_vm14, %v947_v8, 0.0  ;;  %v1023_v3 = vsel %vm928_vm14, %v951_v16, 0.0 }
 0x15a   :  { %v1633_v46 = vpop.f32.mrb[0].mxu0  ;;  %v958_v18 = vpop.permute.xlu1 %957 }
 0x15b   :  { %v1024_v20 = vsel %vm928_vm14, %v958_v18, 0.0  ;;  %v962_v21 = vpop.permute.xlu0 %961  ;;  %v1634_v15 = vpop.f32.mrb[1].mxu0 }
 0x15c   :  { %v1025_v28 = vsel %vm928_vm14, %v962_v21, 0.0  ;;  %v1635_v29 = vadd.f32 %v1634_v15, %v1633_v46  ;;  %v1636_v26 = vpop.f32.mrb[2].mxu0 }
 0x15d   :  { %v1637_v1 = vpop.f32.mrb[3].mxu0 }
 0x15e   :  { %v1036_v32 = vadd.f32 %v1635_v29, %v1020_v6  ;;  %v1638_v33 = vadd.f32 %v1637_v1, %v1636_v26  ;;  %v969_v34 = vpop.permute.xlu1 %968 }
 0x15f   :  { %v2561_v58 = vsel %vm928_vm14, %v969_v34, 0.0  ;;  %v973_v36 = vpop.permute.xlu0 %972 }
 0x160   :  { %v1037_v61 = vadd.f32 %v1638_v33, %v1021_v45  ;;  %v2565_v0 = vsel %vm928_vm14, %v973_v36, 0.0 }
 0x162   :  { %v1066_v38 = vpop.permute.xlu1 %1065 }
 0x163   :  { %v1150_v59 = vsel %vm2567_vm1, %v1066_v38, 0.0  ;;  %v1070_v39 = vpop.permute.xlu0 %1069 }
 0x164   :  { %v1166_v7 = vadd.f32 %v1150_v59, %v1036_v32  ;;  %v1151_v30 = vsel %vm2567_vm1, %v1070_v39, 0.0 }
 0x165   :  { %v1167_v53 = vadd.f32 %v1151_v30, %v1037_v61 }
 0x166   :  { %v1639_v54 = vpop.f32.mrb[4].mxu0  ;;  %v1077_v55 = vpop.permute.xlu1 %1076 }
 0x167   :  { %v1152_v57 = vsel %vm2567_vm1, %v1077_v55, 0.0  ;;  %v1081_v4 = vpop.permute.xlu0 %1080  ;;  %v1640_v13 = vpop.f32.mrb[5].mxu0 }
 0x168   :  { %v1153_v43 = vsel %vm2567_vm1, %v1081_v4, 0.0  ;;  %v1641_v10 = vadd.f32 %v1640_v13, %v1639_v54  ;;  %v1642_v2 = vpop.f32.mrb[6].mxu0 }
 0x169   :  { %v1643_v37 = vpop.f32.mrb[7].mxu0 }
 0x16a   :  { %v1038_v14 = vadd.f32 %v1641_v10, %v1022_v23  ;;  %v1644_v25 = vadd.f32 %v1643_v37, %v1642_v2  ;;  %v2579_v40 = vpop.permute.xlu1 %979 }
 0x16b   :  { %v2581_v9 = vpop.permute.xlu0 %983 }
 0x16c   :  { %v1039_v41 = vadd.f32 %v1644_v25, %v1023_v3  ;;  %v1168_v62 = vadd.f32 %v1152_v57, %v1038_v14 }
 0x16e   :  { %v1088_v11 = vpop.permute.xlu1 %1087  ;;  %v1169_v63 = vadd.f32 %v1153_v43, %v1039_v41 }
 0x16f   :  { %v1092_v17 = vpop.permute.xlu0 %1091  ;;  %v1154_v50 = vsel %vm2567_vm1, %v1088_v11, 0.0 }
 0x170   :  { %v1155_v45 = vsel %vm2567_vm1, %v1092_v17, 0.0 }
 0x172   :  { %v1645_v27 = vpop.f32.mrb[8].mxu0  ;;  %v2583_v35 = vpop.permute.xlu1 %990 }
 0x173   :  { %v2585_v44 = vpop.permute.xlu0 %994  ;;  %v1646_v5 = vpop.f32.mrb[9].mxu0 }
 0x174   :  { %v1647_v51 = vadd.f32 %v1646_v5, %v1645_v27  ;;  %v1648_v42 = vpop.f32.mrb[10].mxu0 }
 0x175   :  { %v1649_v31 = vpop.f32.mrb[11].mxu0 }
 0x176   :  { %v1040_v56 = vadd.f32 %v1647_v51, %v1024_v20  ;;  %v1650_v48 = vadd.f32 %v1649_v31, %v1648_v42  ;;  %v1099_v19 = vpop.permute.xlu1 %1098 }
 0x177   :  { %v1103_v22 = vpop.permute.xlu0 %1102 }
 0x178   :  { %v1041_v52 = vadd.f32 %v1650_v48, %v1025_v28  ;;  %v1170_v6 = vadd.f32 %v1154_v50, %v1040_v56  ;;  %v1157_v43 = vsel %vm2567_vm1, %v1103_v22, 0.0 }
 0x17a   :  { %v1196_v8 = vpop.permute.xlu1 %1195  ;;  %v1171_v16 = vadd.f32 %v1155_v45, %v1041_v52  ;;  %v1029_v45 = vsel %vm928_vm14, %v2581_v9, 0.0 }
 0x17b   :  { %v1280_v23 = vsel %vm2591_vm4, %v1196_v8, 0.0  ;;  %v1200_v3 = vpop.permute.xlu0 %1199 }
 0x17c   :  { %v1296_v46 = vadd.f32 %v1280_v23, %v1166_v7  ;;  %v1281_v18 = vsel %vm2591_vm4, %v1200_v3, 0.0 }
 0x17d   :  { %v1297_v20 = vadd.f32 %v1281_v18, %v1167_v53  ;;  %v1156_v53 = vsel %vm2567_vm1, %v1099_v19, 0.0  ;;  %v1028_v19 = vsel %vm928_vm14, %v2579_v40, 0.0 }
 0x17e   :  { %v1651_v21 = vpop.f32.mrb[12].mxu0  ;;  %v1207_v15 = vpop.permute.xlu1 %1206 }
 0x17f   :  { %v1312_v28 = vmax.f32 %v1296_v46, %v1297_v20  ;;  %v1282_v29 = vsel %vm2591_vm4, %v1207_v15, 0.0  ;;  %v1211_v26 = vpop.permute.xlu0 %1210  ;;  %v1652_v1 = vpop.f32.mrb[13].mxu0 }
 0x180   :  { %v1298_v32 = vadd.f32 %v1282_v29, %v1168_v62  ;;  %v1283_v33 = vsel %vm2591_vm4, %v1211_v26, 0.0  ;;  %v1653_v34 = vadd.f32 %v1652_v1, %v1651_v21  ;;  %v1654_v36 = vpop.f32.mrb[14].mxu0 }
 0x181   :  { %v1313_v61 = vrot.slane %v1312_v28, 4  ;;  %v1299_v38 = vadd.f32 %v1283_v33, %v1169_v63  ;;  %v1655_v59 = vpop.f32.mrb[15].mxu0 }
 0x182   :  { %v1042_v39 = vadd.f32 %v1653_v34, %v2561_v58  ;;  %v1656_v7 = vadd.f32 %v1655_v59, %v1654_v36  ;;  %v2606_v30 = vpop.permute.xlu1 %1001 }
 0x183   :  { %v1314_v54 = vmax.f32 %v1312_v28, %v1313_v61  ;;  %v1319_v55 = vmax.f32 %v1298_v32, %v1299_v38  ;;  %v2610_v57 = vpop.permute.xlu0 %1005 }
 0x184   :  { %v1043_v4 = vadd.f32 %v1656_v7, %v2565_v0  ;;  %v1172_v13 = vadd.f32 %v1156_v53, %v1042_v39 }
 0x185   :  { %v1315_v10 = vrot.slane %v1314_v54, 2  ;;  %v1320_v2 = vrot.slane %v1319_v55, 4 }
 0x186   :  { %v1110_v37 = vpop.permute.xlu1 %1109  ;;  %v1173_v58 = vadd.f32 %v1157_v43, %v1043_v4  ;;  %v1030_v4 = vsel %vm928_vm14, %v2583_v35, 0.0 }
 0x187   :  { %v1316_v14 = vmax.f32 %v1314_v54, %v1315_v10  ;;  %v1321_v25 = vmax.f32 %v1319_v55, %v1320_v2  ;;  %v1114_v41 = vpop.permute.xlu0 %1113  ;;  %v1158_v18 = vsel %vm2567_vm1, %v1110_v37, 0.0 }
 0x188   :  { %v1159_v28 = vsel %vm2567_vm1, %v1114_v41, 0.0 }
 0x189   :  { %v1322_v62 = vrot.slane %v1321_v25, 2  ;;  %v1317_v17 = vrot.slane %v1316_v14, 1 }
 0x18a   :  { %v1657_v11 = vpop.f32.mrb[16].mxu0  ;;  %v1218_v63 = vpop.permute.xlu1 %1217 }
 0x18b   :  { %v1323_v27 = vmax.f32 %v1321_v25, %v1322_v62  ;;  %v1284_v5 = vsel %vm2591_vm4, %v1218_v63, 0.0  ;;  %v1222_v0 = vpop.permute.xlu0 %1221  ;;  %v1658_v51 = vpop.f32.mrb[17].mxu0  ;;  %v1318_v3 = vmax.f32 %v1316_v14, %v1317_v17 }
 0x18c   :  { %v1300_v42 = vadd.f32 %v1284_v5, %v1170_v6  ;;  %v1285_v31 = vsel %vm2591_vm4, %v1222_v0, 0.0  ;;  %v1659_v56 = vadd.f32 %v1658_v51, %v1657_v11  ;;  %v1660_v48 = vpop.f32.mrb[18].mxu0 }
 0x18d   :  { %v1324_v50 = vrot.slane %v1323_v27, 1  ;;  %v1301_v22 = vadd.f32 %v1285_v31, %v1171_v16  ;;  %v1661_v52 = vpop.f32.mrb[19].mxu0 }
 0x18e   :  { %v1044_v8 = vadd.f32 %v1659_v56, %v1028_v19  ;;  %v1662_v23 = vadd.f32 %v1661_v52, %v1660_v48  ;;  %v2625_v6 = vpop.permute.xlu1 %1012 }
 0x18f   :  { %v1325_v46 = vmax.f32 %v1323_v27, %v1324_v50  ;;  %v1326_v20 = vmax.f32 %v1300_v42, %v1301_v22  ;;  %v2629_v21 = vpop.permute.xlu0 %1016 }
 0x190   :  { %v1045_v40 = vadd.f32 %v1662_v23, %v1029_v45  ;;  %v1174_v16 = vadd.f32 %v1158_v18, %v1044_v8 }
 0x191   :  { %v1400_v15 = vsel %vm1399_vm5, %v1325_v46, %v1318_v3  ;;  %v1327_v9 = vrot.slane %v1326_v20, 4 }
 0x192   :  { %v1121_v29 = vpop.permute.xlu1 %1120  ;;  %v1175_v26 = vadd.f32 %v1159_v28, %v1045_v40  ;;  %v1033_v28 = vsel %vm928_vm14, %v2610_v57, 0.0 }
 0x193   :  { %v1328_v1 = vmax.f32 %v1326_v20, %v1327_v9  ;;  %v1125_v32 = vpop.permute.xlu0 %1124  ;;  %v1160_v62 = vsel %vm2567_vm1, %v1121_v29, 0.0  ;;  %v1032_v20 = vsel %vm928_vm14, %v2606_v30, 0.0 }
 0x194   :  { %v1161_v35 = vsel %vm2567_vm1, %v1125_v32, 0.0 }
 0x195   :  { %v1329_v33 = vrot.slane %v1328_v1, 2 }
 0x196   :  { %v1663_v34 = vpop.f32.mrb[20].mxu0  ;;  %v1229_v36 = vpop.permute.xlu1 %1228 }
 0x197   :  { %v1330_v61 = vmax.f32 %v1328_v1, %v1329_v33  ;;  %v1286_v38 = vsel %vm2591_vm4, %v1229_v36, 0.0  ;;  %v1233_v59 = vpop.permute.xlu0 %1232  ;;  %v1664_v39 = vpop.f32.mrb[21].mxu0 }
 0x198   :  { %v1302_v7 = vadd.f32 %v1286_v38, %v1172_v13  ;;  %v1287_v53 = vsel %vm2591_vm4, %v1233_v59, 0.0  ;;  %v1665_v54 = vadd.f32 %v1664_v39, %v1663_v34  ;;  %v1666_v55 = vpop.f32.mrb[22].mxu0  ;;  %v1031_v13 = vsel %vm928_vm14, %v2585_v44, 0.0 }
 0x199   :  { %v1331_v43 = vrot.slane %v1330_v61, 1  ;;  %v1303_v10 = vadd.f32 %v1287_v53, %v1173_v58  ;;  %v1667_v2 = vpop.f32.mrb[23].mxu0 }
 0x19a   :  { %v1046_v37 = vadd.f32 %v1665_v54, %v1030_v4  ;;  %v1668_v14 = vadd.f32 %v1667_v2, %v1666_v55  ;;  %v1132_v25 = vpop.permute.xlu1 %1131 }
 0x19b   :  { %v1332_v41 = vmax.f32 %v1330_v61, %v1331_v43  ;;  %v1333_v11 = vmax.f32 %v1302_v7, %v1303_v10  ;;  %v1136_v63 = vpop.permute.xlu0 %1135  ;;  %v1162_v32 = vsel %vm2567_vm1, %v1132_v25, 0.0 }
 0x19c   :  { %v1047_v17 = vadd.f32 %v1668_v14, %v1031_v13  ;;  %v1176_v27 = vadd.f32 %v1160_v62, %v1046_v37  ;;  %v1163_v57 = vsel %vm2567_vm1, %v1136_v63, 0.0 }
 0x19d   :  { %v1334_v58 = vrot.slane %v1333_v11, 4  ;;  %v1402_v5 = vsel %vm1401_vm6, %v1332_v41, %v1400_v15 }
 0x19e   :  { %v1240_v0 = vpop.permute.xlu1 %1239  ;;  %v1177_v51 = vadd.f32 %v1161_v35, %v1047_v17 }
 0x19f   :  { %v1335_v42 = vmax.f32 %v1333_v11, %v1334_v58  ;;  %v1288_v31 = vsel %vm2591_vm4, %v1240_v0, 0.0  ;;  %v1244_v44 = vpop.permute.xlu0 %1243 }
 0x1a0   :  { %v1304_v56 = vadd.f32 %v1288_v31, %v1174_v16  ;;  %v1289_v48 = vsel %vm2591_vm4, %v1244_v44, 0.0 }
 0x1a1   :  { %v1336_v19 = vrot.slane %v1335_v42, 2  ;;  %v1305_v50 = vadd.f32 %v1289_v48, %v1175_v26 }
 0x1a2   :  { %v1669_v22 = vpop.f32.mrb[24].mxu0  ;;  %v1143_v52 = vpop.permute.xlu1 %1142 }
 0x1a3   :  { %v1337_v45 = vmax.f32 %v1335_v42, %v1336_v19  ;;  %v1340_v8 = vmax.f32 %v1304_v56, %v1305_v50  ;;  %v2651_v23 = vpop.permute.xlu0 %1146  ;;  %v1670_v3 = vpop.f32.mrb[25].mxu0  ;;  %v1035_v19 = vsel %vm928_vm14, %v2629_v21, 0.0  ;;  %v1164_v50 = vsel %vm2567_vm1, %v1143_v52, 0.0 }
 0x1a4   :  { %v1671_v46 = vadd.f32 %v1670_v3, %v1669_v22  ;;  %v1672_v18 = vpop.f32.mrb[26].mxu0 }
 0x1a5   :  { %v1338_v40 = vrot.slane %v1337_v45, 1  ;;  %v1341_v16 = vrot.slane %v1340_v8, 4  ;;  %v1673_v15 = vpop.f32.mrb[27].mxu0 }
 0x1a6   :  { %v1048_v9 = vadd.f32 %v1671_v46, %v1032_v20  ;;  %v1674_v29 = vadd.f32 %v1673_v15, %v1672_v18  ;;  %v1251_v26 = vpop.permute.xlu1 %1250 }
 0x1a7   :  { %v1339_v1 = vmax.f32 %v1337_v45, %v1338_v40  ;;  %v1342_v33 = vmax.f32 %v1340_v8, %v1341_v16  ;;  %v1290_v34 = vsel %vm2591_vm4, %v1251_v26, 0.0  ;;  %v1255_v30 = vpop.permute.xlu0 %1254 }
 0x1a8   :  { %v1049_v36 = vadd.f32 %v1674_v29, %v1033_v28  ;;  %v1306_v61 = vadd.f32 %v1290_v34, %v1176_v27  ;;  %v1291_v38 = vsel %vm2591_vm4, %v1255_v30, 0.0  ;;  %v1178_v59 = vadd.f32 %v1162_v32, %v1048_v9  ;;  %v1485_v30 = vld [vmem:[%s2756_s5] sm:$0xff] }
 0x1a9   :  { %v1343_v39 = vrot.slane %v1342_v33, 2  ;;  %v1307_v7 = vadd.f32 %v1291_v38, %v1177_v51  ;;  %v1404_v53 = vsel %vm1403_vm7, %v1339_v1, %v1402_v5  ;;  %v1034_v5 = vsel %vm928_vm14, %v2625_v6, 0.0 }
 0x1aa   :  { %v1262_v54 = vpop.permute.xlu1 %1261  ;;  %v1179_v55 = vadd.f32 %v1163_v57, %v1049_v36  ;;  %v1165_v6 = vsel %vm2567_vm1, %v2651_v23, 0.0  ;;  %v1810_v38 = vpack.c.bf16 %v1486_v12, %v1485_v30  ;;  %v1488_v57 = vld [vmem:[%s2756_s5 + $0x18] sm:$0xff] }
 0x1ab   :  { %v1344_v4 = vmax.f32 %v1342_v33, %v1343_v39  ;;  %v1347_v43 = vmax.f32 %v1306_v61, %v1307_v7  ;;  %v1292_v10 = vsel %vm2591_vm4, %v1262_v54, 0.0  ;;  %v1266_v2 = vpop.permute.xlu0 %1265  ;;  %v1490_v54 = vld [vmem:[%s2756_s5 + $0x28] sm:$0xff] }
 0x1ac   :  { %v1308_v37 = vadd.f32 %v1292_v10, %v1178_v59  ;;  %v1293_v14 = vsel %vm2591_vm4, %v1266_v2, 0.0  ;;  %v1487_v59 = vld [vmem:[%s2756_s5 + $0x10] sm:$0xff]  ;;  %v1493_v10 = vld [vmem:[%s2756_s5 + $0x40] sm:$0xff]  ;;  %v1494_v2 = vld [vmem:[%s2756_s5 + $0x48] sm:$0xff] }
 0x1ad   :  { %v1345_v25 = vrot.slane %v1344_v4, 1  ;;  %v1348_v13 = vrot.slane %v1347_v43, 4  ;;  %v1309_v41 = vadd.f32 %v1293_v14, %v1179_v55  ;;  %v1813_v7 = vpack.c.bf16 %v1488_v57, %v1487_v59  ;;  %v1495_v14 = vld [vmem:[%s2756_s5 + $0x50] sm:$0xff] }
 0x1ae   :  { %v1675_v62 = vpop.f32.mrb[28].mxu0  ;;  %v1273_v44 = vpop.permute.xlu1 %1272 }
 0x1af   :  { %v1346_v11 = vmax.f32 %v1344_v4, %v1345_v25  ;;  %v1349_v63 = vmax.f32 %v1347_v43, %v1348_v13  ;;  %v1354_v17 = vmax.f32 %v1308_v37, %v1309_v41  ;;  %v1676_v27 = vpop.f32.mrb[29].mxu0  ;;  %v1277_v8 = vpop.permute.xlu0 %1276  ;;  %v1294_v40 = vsel %vm2591_vm4, %v1273_v44, 0.0  ;;  %v1491_v4 = vld [vmem:[%s2756_s5 + $0x30] sm:$0xff]  ;;  %v1496_v25 = vld [vmem:[%s2756_s5 + $0x58] sm:$0xff]  ;;  %v1497_v41 = vld [vmem:[%s2756_s5 + $0x60] sm:$0xff] }
 0x1b0   :  { %v1677_v35 = vadd.f32 %v1676_v27, %v1675_v62  ;;  %v1678_v58 = vpop.f32.mrb[30].mxu0  ;;  %v1295_v52 = vsel %vm2591_vm4, %v1277_v8, 0.0  ;;  %v1822_v37 = vpack.c.bf16 %v1494_v2, %v1493_v10  ;;  %v1825_v13 = vpack.c.bf16 %v1496_v25, %v1495_v14  ;;  %v1498_v62 = vld [vmem:[%s2756_s5 + $0x68] sm:$0xff] }
 0x1b1   :  { %v1350_v0 = vrot.slane %v1349_v63, 2  ;;  %v1355_v51 = vrot.slane %v1354_v17, 4  ;;  %v1679_v42 = vpop.f32.mrb[31].mxu0  ;;  %v1406_v31 = vsel %vm1405_vm8, %v1346_v11, %v1404_v53  ;;  %v1489_v53 = vld [vmem:[%s2756_s5 + $0x20] sm:$0xff]  ;;  %v1828_v11 = vpack.c.bf16 %v1498_v62, %v1497_v41 }
 0x1b2   :  { %v1050_v56 = vadd.f32 %v1677_v35, %v1034_v5  ;;  %v1680_v48 = vadd.f32 %v1679_v42, %v1678_v58  ;;  %v1816_v55 = vpack.c.bf16 %v1490_v54, %v1489_v53  ;;  %v1615_v35 = vld [vmem:[%s2757_s4] ss:$0 sm:$0xff] }
 0x1b3   :  { %v1351_v22 = vmax.f32 %v1349_v63, %v1350_v0  ;;  %v1356_v45 = vmax.f32 %v1354_v17, %v1355_v51  ;;  %v1499_v63 = vld [vmem:[%s2756_s5 + $0x70] sm:$0xff]  ;;  %v1500_v17 = vld [vmem:[%s2756_s5 + $0x78] sm:$0xff] }
 0x1b4   :  { %v1180_v3 = vadd.f32 %v1164_v50, %v1050_v56  ;;  %v1051_v46 = vadd.f32 %v1680_v48, %v1035_v19  ;;  %v1831_v27 = vpack.c.bf16 %v1500_v17, %v1499_v63 }
 0x1b5   :  { %v1352_v18 = vrot.slane %v1351_v22, 1  ;;  %v1357_v20 = vrot.slane %v1356_v45, 2 }
 0x1b6   :  { %v1310_v16 = vadd.f32 %v1294_v40, %v1180_v3  ;;  %v1181_v24 = vadd.f32 %v1165_v6, %v1051_v46 }
 0x1b7   :  { %v1353_v21 = vmax.f32 %v1351_v22, %v1352_v18  ;;  %v1358_v15 = vmax.f32 %v1356_v45, %v1357_v20 }
 0x1b8   :  { %v1311_v28 = vadd.f32 %v1295_v52, %v1181_v24 }
 0x1b9   :  { %v1359_v9 = vrot.slane %v1358_v15, 1  ;;  %v1408_v29 = vsel %vm1407_vm9, %v1353_v21, %v1406_v31 }
 0x1ba   :  { %v1361_v26 = vmax.f32 %v1310_v16, %v1311_v28 }
 0x1bb   :  { %v1360_v60 = vmax.f32 %v1358_v15, %v1359_v9 }
 0x1bc   :  { %v1362_v23 = vrot.slane %v1361_v26, 4 }
 0x1bd   :  { %v1410_v1 = vsel %vm1409_vm10, %v1360_v60, %v1408_v29 }
 0x1be   :  { %v1363_v32 = vmax.f32 %v1361_v26, %v1362_v23 }
 0x1c0   :  { %v1364_v33 = vrot.slane %v1363_v32, 2 }
 0x1c2   :  { %v1365_v34 = vmax.f32 %v1363_v32, %v1364_v33 }
 0x1c4   :  { %v1366_v36 = vrot.slane %v1365_v34, 1 }
 0x1c6   :  { %v1367_v61 = vmax.f32 %v1365_v34, %v1366_v36 }
 0x1c8   :  { %v1412_v39 = vsel %vm1411_vm11, %v1367_v61, %v1410_v1 }
 0x1c9   :  { %1748 = vmatmul.mubr.f32.vlgmr.msra.gmra.mrb[0].mxu1 %v1412_v39 }
 0x1ca   :  { %1811 = vmatpush3.bf16.msra.mxu1 %v1810_v38  ;;  %1782 = vmatprep.mubr.msk.f32.mxu1 %vm1881_vm13, %v1882_v49  ;;  %v1492_v49 = vld [vmem:[%s2756_s5 + $0x38] sm:$0xff] }
 0x1cb   :  { %1812 = vmatprep.subr.bf16.mxu1 %v1880_v47  ;;  %v1819_v43 = vpack.c.bf16 %v1492_v49, %v1491_v4 }
 0x1ce   :  { %1814 = vmatpush3.bf16.msra.mxu1 %v1813_v7 }
 0x1cf   :  { %1815 = vmatprep.subr.bf16.mxu1 %v1880_v47 }
 0x1d2   :  { %1817 = vmatpush3.bf16.msra.mxu1 %v1816_v55 }
 0x1d3   :  { %1818 = vmatprep.subr.bf16.mxu1 %v1880_v47 }
 0x1d6   :  { %1820 = vmatpush3.bf16.msra.mxu1 %v1819_v43 }
 0x1d7   :  { %1821 = vmatprep.subr.bf16.mxu1 %v1880_v47 }
 0x1da   :  { %1823 = vmatpush3.bf16.msra.mxu1 %v1822_v37 }
 0x1db   :  { %1824 = vmatprep.subr.bf16.mxu1 %v1880_v47 }
 0x1de   :  { %1826 = vmatpush3.bf16.msra.mxu1 %v1825_v13 }
 0x1df   :  { %1827 = vmatprep.subr.bf16.mxu1 %v1880_v47 }
 0x1e2   :  { %1829 = vmatpush3.bf16.msra.mxu1 %v1828_v11 }
 0x1e3   :  { %1830 = vmatprep.subr.bf16.mxu1 %v1880_v47  ;;  %v1616_v47 = vld [vmem:[%s2758_s6] ss:$0 sm:$0xff] }
 0x1e6   :  { %1832 = vmatpush3.bf16.msra.mxu1 %v1831_v27 }
 0x29c   :  { %v1480_v58 = vpop.f32.mrb[0].mxu1 }
 0x29d   :  { %v1481_v5 = vadd.f32 %v1615_v35, %v1480_v58  ;;  %v1749_v0 = vpop.f32.mrb[1].mxu1 }
 0x29f   :  { %v1484_v51 = vmax.f32 %v1481_v5, 0.0 }
 0x2a1   :  { %1783 = vmatmul.mubr.f32.vlgmr.msra.gmra.mrb[2].mxu1 %v1484_v51 }
 0x374   :  { %v1574_v42 = vpop.f32.mrb[2].mxu1 }
 0x375   :  { %v1575_v31 = vadd.f32 %v1616_v47, %v1574_v42  ;;  %v1784_v44 = vpop.f32.mrb[3].mxu1 }
 0x377   :  { %1578 = vst [vmem:[%s2759_s7] sm:$0xff] %v1575_v31 }

</bundles_post_ra>
